<compile_context>
chip_gen: v5e
topology: v5e:2x2
jax: 0.10.0
libtpu: 0.0.40
codegen_flags: <defaults>
</compile_context>

<pallas_src>
import jax
import jax.numpy as jnp
from jax.experimental import pallas as pl
from jax.experimental.pallas import tpu as pltpu


# ---------------------------------------------------------------------------
# Fused bidirectional LSTM-layer kernel (time-blocked grid; both directions in
# one program per time block; h/c and the hoisted per-block x-projections live
# in VMEM scratch).
# ---------------------------------------------------------------------------
def _make_layer_kernel(part_dims, dedup, TB, Bp, H, nb, t_valid, mask_pad, mm_dtype):
    """Kernel factory.

    Ref order: xfwd_0..xfwd_{n-1}, [xbwd_0..xbwd_{n-1} unless dedup],
               wx_f, wh_f, wx_b, wh_b, b_f, b_b,
               out_f, out_b,
               h_f, c_f, h_b, c_b, xproj_f, xproj_b
    """
    n_x = len(part_dims)

    def kernel(*refs):
        p = 0
        xf = refs[p:p + n_x]; p += n_x
        if dedup:
            xb = xf
        else:
            xb = refs[p:p + n_x]; p += n_x
        wxf_ref, whf_ref, wxb_ref, whb_ref, bf_ref, bb_ref = refs[p:p + 6]; p += 6
        of_ref, ob_ref = refs[p:p + 2]; p += 2
        hf_s, cf_s, hb_s, cb_s, xpf, xpb = refs[p:p + 6]

        g = pl.program_id(0)

        @pl.when(g == 0)
        def _():
            hf_s[...] = jnp.zeros_like(hf_s)
            cf_s[...] = jnp.zeros_like(cf_s)
            hb_s[...] = jnp.zeros_like(hb_s)
            cb_s[...] = jnp.zeros_like(cb_s)

        # ---- Hoisted, time-parallel input projection (bias folded in). ----
        # One big (TB*Bp, D) @ (D, 4H) GEMM per direction per grid step; the
        # per-timestep recurrence below never touches x or the bias again.
        def project(x_refs, wx_ref, b_ref, xp_ref):
            acc = None
            off = 0
            for r, d in zip(x_refs, part_dims):
                x2d = r[...].reshape(TB * Bp, d).astype(mm_dtype)
                w = wx_ref[off:off + d, :]
                part = jnp.dot(x2d, w, preferred_element_type=jnp.float32)
                acc = part if acc is None else acc + part
                off += d
            acc = acc + b_ref[...]           # single (1,4H) broadcast per grid step
            xp_ref[...] = acc.reshape(TB, Bp, 4 * H)

        project(xf, wxf_ref, bf_ref, xpf)
        project(xb, wxb_ref, bb_ref, xpb)

        # Recurrent weights loaded once per grid step (small at these H).
        wh_f = whf_ref[...]
        wh_b = whb_ref[...]

        def cell(xp_row, h, c, wh_mat):
            gates = xp_row + jnp.dot(h.astype(mm_dtype), wh_mat,
                                     preferred_element_type=jnp.float32)
            # EUP: one full-tile sigmoid + tanh only on the g slice.
            sig = jax.nn.sigmoid(gates)
            i_g = sig[:, 0 * H:1 * H]
            f_g = sig[:, 1 * H:2 * H]
            o_g = sig[:, 3 * H:4 * H]
            g_g = jnp.tanh(gates[:, 2 * H:3 * H])
            c_new = f_g * c + i_g * g_g
            h_new = o_g * jnp.tanh(c_new)
            return h_new, c_new

        def body(s, carry):
            h_f, c_f, h_b, c_b = carry
            # Forward direction: local time s (global time g*TB + s).
            h_f, c_f = cell(xpf[s], h_f, c_f, wh_f)
            of_ref[s] = h_f
            # Backward direction: local time TB-1-s of the reversed block; the
            # input/output index_maps already select block nb-1-g, so the
            # recurrence walks global time T-1 .. 0 as g increases.
            rb = TB - 1 - s
            h_bn, c_bn = cell(xpb[rb], h_b, c_b, wh_b)
            if mask_pad:
                # Padded timesteps (global time >= t_valid) pass h/c through
                # unchanged so they cannot contaminate the backward recurrence.
                gt = (nb - 1 - g) * TB + rb
                valid = gt < t_valid
                h_bn = jnp.where(valid, h_bn, h_b)
                c_bn = jnp.where(valid, c_bn, c_b)
            ob_ref[rb] = h_bn
            return h_f, c_f, h_bn, c_bn

        carry = (hf_s[...], cf_s[...], hb_s[...], cb_s[...])
        carry = jax.lax.fori_loop(0, TB, body, carry, unroll=min(TB, 8))
        hf_s[...], cf_s[...], hb_s[...], cb_s[...] = carry

    return kernel


def bidir_lstm_layer(xs, layer, hidden, time_block, t_valid, mm_dtype=jnp.float32):
    """One fused bidirectional LSTM layer.

    xs: list of (Tp, Bp, Di) activation arrays (previous layer's fwd/bwd halves,
        or a single input array); folded into the hoisted projection in-kernel.
    layer: dict with wx_f/wh_f/b_f and wx_b/wh_b/b_b
           (wx: (sum(Di), 4H), wh: (H, 4H), b: (1, 4H); PyTorch gate order i,f,g,o).
    Returns (out_fwd, out_bwd), each (Tp, Bp, H), in forward time order.
    """
    Tp, Bp = int(xs[0].shape[0]), int(xs[0].shape[1])
    H = hidden
    TB = time_block
    assert Tp % TB == 0, (Tp, TB)
    nb = Tp // TB
    dedup = (nb == 1)
    mask_pad = (t_valid != Tp)
    part_dims = tuple(int(x.shape[2]) for x in xs)
    din = sum(part_dims)

    wx_f = layer["wx_f"].astype(mm_dtype)
    wh_f = layer["wh_f"].astype(mm_dtype)
    wx_b = layer["wx_b"].astype(mm_dtype)
    wh_b = layer["wh_b"].astype(mm_dtype)
    b_f, b_b = layer["b_f"], layer["b_b"]
    assert wx_f.shape == (din, 4 * H) and wh_f.shape == (H, 4 * H)

    # Forward-time views of the input(s).
    in_specs = [pl.BlockSpec((TB, Bp, d), lambda g: (g, 0, 0)) for d in part_dims]
    # Reversed-time views of the same HBM arrays (skipped when nb == 1).
    if not dedup:
        in_specs += [pl.BlockSpec((TB, Bp, d), lambda g, _nb=nb: (_nb - 1 - g, 0, 0))
                     for d in part_dims]

    # Grid-invariant weights/biases: constant block, single-buffered.
    def const_spec(arr):
        nd = arr.ndim
        return pl.BlockSpec(tuple(int(s) for s in arr.shape),
                            lambda g: (0,) * nd,
                            pipeline_mode=pl.Buffered(1))

    in_specs += [const_spec(a) for a in (wx_f, wh_f, wx_b, wh_b, b_f, b_b)]

    out_specs = [
        pl.BlockSpec((TB, Bp, H), lambda g: (g, 0, 0)),
        pl.BlockSpec((TB, Bp, H), lambda g, _nb=nb: (_nb - 1 - g, 0, 0)),
    ]

    args = list(xs) + (list(xs) if not dedup else []) + [wx_f, wh_f, wx_b, wh_b, b_f, b_b]

    out_f, out_b = pl.pallas_call(
        _make_layer_kernel(part_dims, dedup, TB, Bp, H, nb, t_valid, mask_pad, mm_dtype),
        out_shape=(jax.ShapeDtypeStruct((Tp, Bp, H), jnp.float32),
                   jax.ShapeDtypeStruct((Tp, Bp, H), jnp.float32)),
        grid_spec=pltpu.PrefetchScalarGridSpec(
            num_scalar_prefetch=0,
            grid=(nb,),
            in_specs=in_specs,
            out_specs=out_specs,
            scratch_shapes=[pltpu.VMEM((Bp, H), jnp.float32)] * 4      # h_f, c_f, h_b, c_b
                          + [pltpu.VMEM((TB, Bp, 4 * H), jnp.float32)] * 2,  # xproj_f, xproj_b
        ),
        compiler_params=pltpu.CompilerParams(
            dimension_semantics=("arbitrary",)),   # sequential time recurrence
    )(*args)
    return out_f, out_b


# ---------------------------------------------------------------------------
# Parameter init (matches nn.LSTM shapes after reset_parameters: weights
# ~N(0, 0.1), biases 0), split as W_x (D,4H), W_h (H,4H), b (1,4H) per direction.
# ---------------------------------------------------------------------------
def init_encoder_params(key, input_size, num_units, nlayers):
    params = []
    in_sz = input_size
    for _ in range(nlayers):
        layer = {}
        for suf in ("f", "b"):
            key, k1, k2 = jax.random.split(key, 3)
            wih = (jax.random.normal(k1, (4 * num_units, in_sz)) * 0.1).astype(jnp.float32)
            whh = (jax.random.normal(k2, (4 * num_units, num_units)) * 0.1).astype(jnp.float32)
            layer["wx_" + suf] = wih.T                                   # (D, 4H)
            layer["wh_" + suf] = whh.T                                   # (H, 4H)
            layer["b_" + suf] = jnp.zeros((1, 4 * num_units), jnp.float32)  # b_ih + b_hh = 0
        params.append(layer)
        in_sz = num_units * 2
    return params


# ---------------------------------------------------------------------------
# EncoderLSTM forward (eval mode: LockedDropout is identity).
# Activations stay in (T, B, D); one transpose in, one transpose out.
# ---------------------------------------------------------------------------
def encoder_lstm_forward(x_btd, params, num_units, concat=True,
                         time_block_cap=32, matmul_dtype=jnp.float32):
    """x_btd: (B, T, D_in), batch-first like the PyTorch module."""
    B, T, _ = x_btd.shape
    Bp = ((B + 7) // 8) * 8                       # pad batch to an 8-sublane multiple
    if T <= time_block_cap:
        TB, Tp = T, T
    else:
        TB = time_block_cap
        Tp = ((T + TB - 1) // TB) * TB            # pad time (masked in-kernel), no tiny divisors

    x_tbd = jnp.transpose(x_btd, (1, 0, 2)).astype(jnp.float32)   # (T, B, D)
    x_tbd = jnp.pad(x_tbd, ((0, Tp - T), (0, Bp - B), (0, 0)))

    xs = [x_tbd]
    layer_outs = []
    for layer in params:
        f, b = bidir_lstm_layer(xs, layer, num_units, TB, T, matmul_dtype)
        layer_outs.append((f, b))
        xs = [f, b]                               # next layer folds f/b into its projection

    if concat:
        parts = [p for fb in layer_outs for p in fb]   # [f1, b1, f2, b2, ...]
    else:
        parts = list(layer_outs[-1])
    out_tbf = jnp.concatenate(parts, axis=-1)          # (Tp, Bp, feat)
    return jnp.transpose(out_tbf, (1, 0, 2))[:B, :T]   # transpose out + unpad


# ---------------------------------------------------------------------------
# Pure-JAX reference (lax.scan) for correctness check.
# ---------------------------------------------------------------------------
def _lstm_ref(x_tbd, wx, wh, b, H, reverse=False):
    Bb = x_tbd.shape[1]

    def step(carry, xt):
        h, c = carry
        gates = xt @ wx + h @ wh + b
        i = jax.nn.sigmoid(gates[:, :H])
        f = jax.nn.sigmoid(gates[:, H:2 * H])
        g = jnp.tanh(gates[:, 2 * H:3 * H])
        o = jax.nn.sigmoid(gates[:, 3 * H:])
        c = f * c + i * g
        h = o * jnp.tanh(c)
        return (h, c), h

    init = (jnp.zeros((Bb, H), jnp.float32), jnp.zeros((Bb, H), jnp.float32))
    _, hs = jax.lax.scan(step, init, x_tbd, reverse=reverse)
    return hs


def encoder_ref(x_btd, params, H, concat=True):
    output = jnp.transpose(x_btd, (1, 0, 2))
    outputs = []
    for layer in params:
        fwd = _lstm_ref(output, layer["wx_f"], layer["wh_f"], layer["b_f"], H)
        bwd = _lstm_ref(output, layer["wx_b"], layer["wh_b"], layer["b_b"], H, reverse=True)
        output = jnp.concatenate([fwd, bwd], axis=-1)
        outputs.append(output)
    res = jnp.concatenate(outputs, axis=-1) if concat else outputs[-1]
    return jnp.transpose(res, (1, 0, 2))


if __name__ == "__main__":
    # Config consistent with the module:
    #   EncoderLSTM(input_size=16, num_units=32, nlayers=2, concat=True,
    #               bidir=True, dropout=0.2, return_last=False)  -- eval mode
    NUM_UNITS, NLAYERS, CONCAT = 32, 2, True
    D_IN = 16

    key = jax.random.PRNGKey(0)
    key, kx = jax.random.split(key)

    # --- Test 1: demo shapes (B=2, T=8): nb==1 dedup path, f32 matmuls. ---
    B, T = 2, 8
    x = jax.random.normal(kx, (B, T, D_IN), dtype=jnp.float32)
    params = init_encoder_params(key, D_IN, NUM_UNITS, NLAYERS)

    out = jax.block_until_ready(
        encoder_lstm_forward(x, params, NUM_UNITS, concat=CONCAT))
    assert out.shape == (B, T, NLAYERS * NUM_UNITS * 2), out.shape
    ref = jax.block_until_ready(encoder_ref(x, params, NUM_UNITS, concat=CONCAT))
    assert jnp.allclose(out, ref, atol=1e-4, rtol=1e-4), \
        float(jnp.max(jnp.abs(out - ref)))

    # --- Test 2: awkward T with a small cap: time padding + backward masking,
    #     nb > 1 reversed-index path. ---
    key, kx2 = jax.random.split(key)
    B2, T2 = 3, 10
    x2 = jax.random.normal(kx2, (B2, T2, D_IN), dtype=jnp.float32)
    out2 = jax.block_until_ready(
        encoder_lstm_forward(x2, params, NUM_UNITS, concat=CONCAT, time_block_cap=8))
    ref2 = jax.block_until_ready(encoder_ref(x2, params, NUM_UNITS, concat=CONCAT))
    assert out2.shape == (B2, T2, NLAYERS * NUM_UNITS * 2), out2.shape
    assert jnp.allclose(out2, ref2, atol=1e-4, rtol=1e-4), \
        float(jnp.max(jnp.abs(out2 - ref2)))

    # --- Test 3: bf16 matmul operands (f32 state/accumulation), looser tolerance. ---
    out3 = jax.block_until_ready(
        encoder_lstm_forward(x, params, NUM_UNITS, concat=CONCAT,
                             matmul_dtype=jnp.bfloat16))
    assert jnp.allclose(out3, ref, atol=5e-2), float(jnp.max(jnp.abs(out3 - ref)))

    print("KERNEL_OK")
</pallas_src>

<mosaic_0001>
module attributes {stable_mosaic.version = 11 : i64} {
  func.func @kernel(%arg0: i32, %arg1: memref<8x8x16xf32, #tpu.memory_space<vmem>>, %arg2: memref<16x128xf32, #tpu.memory_space<vmem>>, %arg3: memref<32x128xf32, #tpu.memory_space<vmem>>, %arg4: memref<16x128xf32, #tpu.memory_space<vmem>>, %arg5: memref<32x128xf32, #tpu.memory_space<vmem>>, %arg6: memref<1x128xf32, #tpu.memory_space<vmem>>, %arg7: memref<1x128xf32, #tpu.memory_space<vmem>>, %arg8: memref<8x8x32xf32, #tpu.memory_space<vmem>>, %arg9: memref<8x8x32xf32, #tpu.memory_space<vmem>>, %arg10: memref<8x32xf32, #tpu.memory_space<vmem>>, %arg11: memref<8x32xf32, #tpu.memory_space<vmem>>, %arg12: memref<8x32xf32, #tpu.memory_space<vmem>>, %arg13: memref<8x32xf32, #tpu.memory_space<vmem>>, %arg14: memref<8x8x128xf32, #tpu.memory_space<vmem>>, %arg15: memref<8x8x128xf32, #tpu.memory_space<vmem>>) attributes {dimension_semantics = [#tpu.dimension_semantics<arbitrary>], iteration_bounds = array<i64: 1>, scalar_prefetch = 0 : i64, scratch_operands = 6 : i64, tpu.core_type = #tpu.core_type<tc>, window_params = [{transform_indices = @transform_0, window_bounds = array<i64: 8, 8, 16>}, {pipeline_mode = #tpu.pipeline_mode<synchronous>, transform_indices = @transform_1, window_bounds = array<i64: 16, 128>}, {pipeline_mode = #tpu.pipeline_mode<synchronous>, transform_indices = @transform_2, window_bounds = array<i64: 32, 128>}, {pipeline_mode = #tpu.pipeline_mode<synchronous>, transform_indices = @transform_3, window_bounds = array<i64: 16, 128>}, {pipeline_mode = #tpu.pipeline_mode<synchronous>, transform_indices = @transform_4, window_bounds = array<i64: 32, 128>}, {pipeline_mode = #tpu.pipeline_mode<synchronous>, transform_indices = @transform_5, window_bounds = array<i64: 1, 128>}, {pipeline_mode = #tpu.pipeline_mode<synchronous>, transform_indices = @transform_6, window_bounds = array<i64: 1, 128>}, {transform_indices = @transform_7, window_bounds = array<i64: 8, 8, 32>}, {transform_indices = @transform_8, window_bounds = array<i64: 8, 8, 32>}]} {
    %c0_i32 = arith.constant 0 : i32
    %0 = arith.cmpi eq, %arg0, %c0_i32 : i32
    %1 = arith.extui %0 : i1 to i32
    %c0_i32_0 = arith.constant 0 : i32
    %2 = arith.cmpi ne, %1, %c0_i32_0 : i32
    scf.if %2 {
      %cst_146 = arith.constant 0.000000e+00 : f32
      %423 = vector.broadcast %cst_146 : f32 to vector<8x32xf32>
      %c0_147 = arith.constant 0 : index
      %c0_148 = arith.constant 0 : index
      %424 = vector.load %arg10[%c0_147, %c0_148] : memref<8x32xf32, #tpu.memory_space<vmem>>, vector<8x32xf32>
      tpu.vector_store %arg10[%c0_147, %c0_148], %423 {strides = array<i32>} : memref<8x32xf32, #tpu.memory_space<vmem>>, vector<8x32xf32>,
      %cst_149 = arith.constant 0.000000e+00 : f32
      %425 = vector.broadcast %cst_149 : f32 to vector<8x32xf32>
      %c0_150 = arith.constant 0 : index
      %c0_151 = arith.constant 0 : index
      %426 = vector.load %arg11[%c0_150, %c0_151] : memref<8x32xf32, #tpu.memory_space<vmem>>, vector<8x32xf32>
      tpu.vector_store %arg11[%c0_150, %c0_151], %425 {strides = array<i32>} : memref<8x32xf32, #tpu.memory_space<vmem>>, vector<8x32xf32>,
      %cst_152 = arith.constant 0.000000e+00 : f32
      %427 = vector.broadcast %cst_152 : f32 to vector<8x32xf32>
      %c0_153 = arith.constant 0 : index
      %c0_154 = arith.constant 0 : index
      %428 = vector.load %arg12[%c0_153, %c0_154] : memref<8x32xf32, #tpu.memory_space<vmem>>, vector<8x32xf32>
      tpu.vector_store %arg12[%c0_153, %c0_154], %427 {strides = array<i32>} : memref<8x32xf32, #tpu.memory_space<vmem>>, vector<8x32xf32>,
      %cst_155 = arith.constant 0.000000e+00 : f32
      %429 = vector.broadcast %cst_155 : f32 to vector<8x32xf32>
      %c0_156 = arith.constant 0 : index
      %c0_157 = arith.constant 0 : index
      %430 = vector.load %arg13[%c0_156, %c0_157] : memref<8x32xf32, #tpu.memory_space<vmem>>, vector<8x32xf32>
      tpu.vector_store %arg13[%c0_156, %c0_157], %429 {strides = array<i32>} : memref<8x32xf32, #tpu.memory_space<vmem>>, vector<8x32xf32>,
    } else {
    }
    %c0 = arith.constant 0 : index
    %c0_1 = arith.constant 0 : index
    %c0_2 = arith.constant 0 : index
    %3 = vector.load %arg1[%c0, %c0_1, %c0_2] : memref<8x8x16xf32, #tpu.memory_space<vmem>>, vector<8x8x16xf32>
    %4 = vector.shape_cast %3 : vector<8x8x16xf32> to vector<64x16xf32>
    %c0_3 = arith.constant 0 : index
    %c0_4 = arith.constant 0 : index
    %5 = vector.load %arg2[%c0_3, %c0_4] : memref<16x128xf32, #tpu.memory_space<vmem>>, vector<16x128xf32>
    %cst = arith.constant dense<0.000000e+00> : vector<64x128xf32>
    %6 = tpu.matmul %4, %5, %cst {dimension_numbers = #tpu.dot_dimension_numbers<[1], [0], [0], [1], [0, 0, 1, 1], [], []>} : vector<64x16xf32>, vector<16x128xf32>, vector<64x128xf32> -> vector<64x128xf32>
    %c0_5 = arith.constant 0 : index
    %c0_6 = arith.constant 0 : index
    %7 = vector.load %arg6[%c0_5, %c0_6] : memref<1x128xf32, #tpu.memory_space<vmem>>, vector<1x128xf32>
    %8 = vector.broadcast %7 : vector<1x128xf32> to vector<64x128xf32>
    %9 = arith.addf %6, %8 : vector<64x128xf32>
    %10 = vector.shape_cast %9 : vector<64x128xf32> to vector<8x8x128xf32>
    %c0_7 = arith.constant 0 : index
    %c0_8 = arith.constant 0 : index
    %c0_9 = arith.constant 0 : index
    %11 = vector.load %arg14[%c0_7, %c0_8, %c0_9] : memref<8x8x128xf32, #tpu.memory_space<vmem>>, vector<8x8x128xf32>
    tpu.vector_store %arg14[%c0_7, %c0_8, %c0_9], %10 {strides = array<i32>} : memref<8x8x128xf32, #tpu.memory_space<vmem>>, vector<8x8x128xf32>,
    %c0_10 = arith.constant 0 : index
    %c0_11 = arith.constant 0 : index
    %c0_12 = arith.constant 0 : index
    %12 = vector.load %arg1[%c0_10, %c0_11, %c0_12] : memref<8x8x16xf32, #tpu.memory_space<vmem>>, vector<8x8x16xf32>
    %13 = vector.shape_cast %12 : vector<8x8x16xf32> to vector<64x16xf32>
    %c0_13 = arith.constant 0 : index
    %c0_14 = arith.constant 0 : index
    %14 = vector.load %arg4[%c0_13, %c0_14] : memref<16x128xf32, #tpu.memory_space<vmem>>, vector<16x128xf32>
    %cst_15 = arith.constant dense<0.000000e+00> : vector<64x128xf32>
    %15 = tpu.matmul %13, %14, %cst_15 {dimension_numbers = #tpu.dot_dimension_numbers<[1], [0], [0], [1], [0, 0, 1, 1], [], []>} : vector<64x16xf32>, vector<16x128xf32>, vector<64x128xf32> -> vector<64x128xf32>
    %c0_16 = arith.constant 0 : index
    %c0_17 = arith.constant 0 : index
    %16 = vector.load %arg7[%c0_16, %c0_17] : memref<1x128xf32, #tpu.memory_space<vmem>>, vector<1x128xf32>
    %17 = vector.broadcast %16 : vector<1x128xf32> to vector<64x128xf32>
    %18 = arith.addf %15, %17 : vector<64x128xf32>
    %19 = vector.shape_cast %18 : vector<64x128xf32> to vector<8x8x128xf32>
    %c0_18 = arith.constant 0 : index
    %c0_19 = arith.constant 0 : index
    %c0_20 = arith.constant 0 : index
    %20 = vector.load %arg15[%c0_18, %c0_19, %c0_20] : memref<8x8x128xf32, #tpu.memory_space<vmem>>, vector<8x8x128xf32>
    tpu.vector_store %arg15[%c0_18, %c0_19, %c0_20], %19 {strides = array<i32>} : memref<8x8x128xf32, #tpu.memory_space<vmem>>, vector<8x8x128xf32>,
    %c0_21 = arith.constant 0 : index
    %c0_22 = arith.constant 0 : index
    %21 = vector.load %arg3[%c0_21, %c0_22] : memref<32x128xf32, #tpu.memory_space<vmem>>, vector<32x128xf32>
    %c0_23 = arith.constant 0 : index
    %c0_24 = arith.constant 0 : index
    %22 = vector.load %arg5[%c0_23, %c0_24] : memref<32x128xf32, #tpu.memory_space<vmem>>, vector<32x128xf32>
    %c0_25 = arith.constant 0 : index
    %c0_26 = arith.constant 0 : index
    %23 = vector.load %arg10[%c0_25, %c0_26] : memref<8x32xf32, #tpu.memory_space<vmem>>, vector<8x32xf32>
    %c0_27 = arith.constant 0 : index
    %c0_28 = arith.constant 0 : index
    %24 = vector.load %arg11[%c0_27, %c0_28] : memref<8x32xf32, #tpu.memory_space<vmem>>, vector<8x32xf32>
    %c0_29 = arith.constant 0 : index
    %c0_30 = arith.constant 0 : index
    %25 = vector.load %arg12[%c0_29, %c0_30] : memref<8x32xf32, #tpu.memory_space<vmem>>, vector<8x32xf32>
    %c0_31 = arith.constant 0 : index
    %c0_32 = arith.constant 0 : index
    %26 = vector.load %arg13[%c0_31, %c0_32] : memref<8x32xf32, #tpu.memory_space<vmem>>, vector<8x32xf32>
    %c0_i32_33 = arith.constant 0 : i32
    %27 = arith.index_cast %c0_i32_33 : i32 to index
    %c0_34 = arith.constant 0 : index
    %c0_35 = arith.constant 0 : index
    %28 = vector.load %arg14[%27, %c0_34, %c0_35] : memref<8x8x128xf32, #tpu.memory_space<vmem>>, vector<1x8x128xf32>
    %29 = vector.shape_cast %28 : vector<1x8x128xf32> to vector<8x128xf32>
    %cst_36 = arith.constant dense<0.000000e+00> : vector<8x128xf32>
    %30 = tpu.matmul %23, %21, %cst_36 {dimension_numbers = #tpu.dot_dimension_numbers<[1], [0], [0], [1], [0, 0, 1, 1], [], []>} : vector<8x32xf32>, vector<32x128xf32>, vector<8x128xf32> -> vector<8x128xf32>
    %31 = arith.addf %29, %30 : vector<8x128xf32>
    %32 = arith.negf %31 : vector<8x128xf32>
    %33 = math.exp %32 : vector<8x128xf32>
    %cst_37 = arith.constant 1.000000e+00 : f32
    %34 = vector.broadcast %cst_37 : f32 to vector<8x128xf32>
    %35 = arith.addf %34, %33 : vector<8x128xf32>
    %36 = arith.divf %34, %35 : vector<8x128xf32>
    %37 = vector.extract_strided_slice %36 {offsets = [0, 0], sizes = [8, 32], strides = [1, 1]} : vector<8x128xf32> to vector<8x32xf32>
    %38 = vector.extract_strided_slice %36 {offsets = [0, 32], sizes = [8, 32], strides = [1, 1]} : vector<8x128xf32> to vector<8x32xf32>
    %39 = vector.extract_strided_slice %36 {offsets = [0, 96], sizes = [8, 32], strides = [1, 1]} : vector<8x128xf32> to vector<8x32xf32>
    %40 = vector.extract_strided_slice %31 {offsets = [0, 64], sizes = [8, 32], strides = [1, 1]} : vector<8x128xf32> to vector<8x32xf32>
    %41 = math.tanh %40 : vector<8x32xf32>
    %42 = arith.mulf %38, %24 : vector<8x32xf32>
    %43 = arith.mulf %37, %41 : vector<8x32xf32>
    %44 = arith.addf %42, %43 : vector<8x32xf32>
    %45 = math.tanh %44 : vector<8x32xf32>
    %46 = arith.mulf %39, %45 : vector<8x32xf32>
    %47 = arith.index_cast %c0_i32_33 : i32 to index
    %c0_38 = arith.constant 0 : index
    %c0_39 = arith.constant 0 : index
    %48 = vector.load %arg8[%47, %c0_38, %c0_39] : memref<8x8x32xf32, #tpu.memory_space<vmem>>, vector<1x8x32xf32>
    %49 = vector.shape_cast %48 : vector<1x8x32xf32> to vector<8x32xf32>
    %50 = vector.shape_cast %46 : vector<8x32xf32> to vector<1x8x32xf32>
    tpu.vector_store %arg8[%47, %c0_38, %c0_39], %50 {strides = array<i32>} : memref<8x8x32xf32, #tpu.memory_space<vmem>>, vector<1x8x32xf32>,
    %c7_i32 = arith.constant 7 : i32
    %51 = arith.subi %c7_i32, %c0_i32_33 : i32
    %52 = arith.index_cast %51 : i32 to index
    %c0_40 = arith.constant 0 : index
    %c0_41 = arith.constant 0 : index
    %53 = vector.load %arg15[%52, %c0_40, %c0_41] : memref<8x8x128xf32, #tpu.memory_space<vmem>>, vector<1x8x128xf32>
    %54 = vector.shape_cast %53 : vector<1x8x128xf32> to vector<8x128xf32>
    %cst_42 = arith.constant dense<0.000000e+00> : vector<8x128xf32>
    %55 = tpu.matmul %25, %22, %cst_42 {dimension_numbers = #tpu.dot_dimension_numbers<[1], [0], [0], [1], [0, 0, 1, 1], [], []>} : vector<8x32xf32>, vector<32x128xf32>, vector<8x128xf32> -> vector<8x128xf32>
    %56 = arith.addf %54, %55 : vector<8x128xf32>
    %57 = arith.negf %56 : vector<8x128xf32>
    %58 = math.exp %57 : vector<8x128xf32>
    %cst_43 = arith.constant 1.000000e+00 : f32
    %59 = vector.broadcast %cst_43 : f32 to vector<8x128xf32>
    %60 = arith.addf %59, %58 : vector<8x128xf32>
    %61 = arith.divf %59, %60 : vector<8x128xf32>
    %62 = vector.extract_strided_slice %61 {offsets = [0, 0], sizes = [8, 32], strides = [1, 1]} : vector<8x128xf32> to vector<8x32xf32>
    %63 = vector.extract_strided_slice %61 {offsets = [0, 32], sizes = [8, 32], strides = [1, 1]} : vector<8x128xf32> to vector<8x32xf32>
    %64 = vector.extract_strided_slice %61 {offsets = [0, 96], sizes = [8, 32], strides = [1, 1]} : vector<8x128xf32> to vector<8x32xf32>
    %65 = vector.extract_strided_slice %56 {offsets = [0, 64], sizes = [8, 32], strides = [1, 1]} : vector<8x128xf32> to vector<8x32xf32>
    %66 = math.tanh %65 : vector<8x32xf32>
    %67 = arith.mulf %63, %26 : vector<8x32xf32>
    %68 = arith.mulf %62, %66 : vector<8x32xf32>
    %69 = arith.addf %67, %68 : vector<8x32xf32>
    %70 = math.tanh %69 : vector<8x32xf32>
    %71 = arith.mulf %64, %70 : vector<8x32xf32>
    %72 = arith.index_cast %51 : i32 to index
    %c0_44 = arith.constant 0 : index
    %c0_45 = arith.constant 0 : index
    %73 = vector.load %arg9[%72, %c0_44, %c0_45] : memref<8x8x32xf32, #tpu.memory_space<vmem>>, vector<1x8x32xf32>
    %74 = vector.shape_cast %73 : vector<1x8x32xf32> to vector<8x32xf32>
    %75 = vector.shape_cast %71 : vector<8x32xf32> to vector<1x8x32xf32>
    tpu.vector_store %arg9[%72, %c0_44, %c0_45], %75 {strides = array<i32>} : memref<8x8x32xf32, #tpu.memory_space<vmem>>, vector<1x8x32xf32>,
    %c1_i32 = arith.constant 1 : i32
    %76 = arith.index_cast %c1_i32 : i32 to index
    %c0_46 = arith.constant 0 : index
    %c0_47 = arith.constant 0 : index
    %77 = vector.load %arg14[%76, %c0_46, %c0_47] : memref<8x8x128xf32, #tpu.memory_space<vmem>>, vector<1x8x128xf32>
    %78 = vector.shape_cast %77 : vector<1x8x128xf32> to vector<8x128xf32>
    %cst_48 = arith.constant dense<0.000000e+00> : vector<8x128xf32>
    %79 = tpu.matmul %46, %21, %cst_48 {dimension_numbers = #tpu.dot_dimension_numbers<[1], [0], [0], [1], [0, 0, 1, 1], [], []>} : vector<8x32xf32>, vector<32x128xf32>, vector<8x128xf32> -> vector<8x128xf32>
    %80 = arith.addf %78, %79 : vector<8x128xf32>
    %81 = arith.negf %80 : vector<8x128xf32>
    %82 = math.exp %81 : vector<8x128xf32>
    %cst_49 = arith.constant 1.000000e+00 : f32
    %83 = vector.broadcast %cst_49 : f32 to vector<8x128xf32>
    %84 = arith.addf %83, %82 : vector<8x128xf32>
    %85 = arith.divf %83, %84 : vector<8x128xf32>
    %86 = vector.extract_strided_slice %85 {offsets = [0, 0], sizes = [8, 32], strides = [1, 1]} : vector<8x128xf32> to vector<8x32xf32>
    %87 = vector.extract_strided_slice %85 {offsets = [0, 32], sizes = [8, 32], strides = [1, 1]} : vector<8x128xf32> to vector<8x32xf32>
    %88 = vector.extract_strided_slice %85 {offsets = [0, 96], sizes = [8, 32], strides = [1, 1]} : vector<8x128xf32> to vector<8x32xf32>
    %89 = vector.extract_strided_slice %80 {offsets = [0, 64], sizes = [8, 32], strides = [1, 1]} : vector<8x128xf32> to vector<8x32xf32>
    %90 = math.tanh %89 : vector<8x32xf32>
    %91 = arith.mulf %87, %44 : vector<8x32xf32>
    %92 = arith.mulf %86, %90 : vector<8x32xf32>
    %93 = arith.addf %91, %92 : vector<8x32xf32>
    %94 = math.tanh %93 : vector<8x32xf32>
    %95 = arith.mulf %88, %94 : vector<8x32xf32>
    %96 = arith.index_cast %c1_i32 : i32 to index
    %c0_50 = arith.constant 0 : index
    %c0_51 = arith.constant 0 : index
    %97 = vector.load %arg8[%96, %c0_50, %c0_51] : memref<8x8x32xf32, #tpu.memory_space<vmem>>, vector<1x8x32xf32>
    %98 = vector.shape_cast %97 : vector<1x8x32xf32> to vector<8x32xf32>
    %99 = vector.shape_cast %95 : vector<8x32xf32> to vector<1x8x32xf32>
    tpu.vector_store %arg8[%96, %c0_50, %c0_51], %99 {strides = array<i32>} : memref<8x8x32xf32, #tpu.memory_space<vmem>>, vector<1x8x32xf32>,
    %c7_i32_52 = arith.constant 7 : i32
    %100 = arith.subi %c7_i32_52, %c1_i32 : i32
    %101 = arith.index_cast %100 : i32 to index
    %c0_53 = arith.constant 0 : index
    %c0_54 = arith.constant 0 : index
    %102 = vector.load %arg15[%101, %c0_53, %c0_54] : memref<8x8x128xf32, #tpu.memory_space<vmem>>, vector<1x8x128xf32>
    %103 = vector.shape_cast %102 : vector<1x8x128xf32> to vector<8x128xf32>
    %cst_55 = arith.constant dense<0.000000e+00> : vector<8x128xf32>
    %104 = tpu.matmul %71, %22, %cst_55 {dimension_numbers = #tpu.dot_dimension_numbers<[1], [0], [0], [1], [0, 0, 1, 1], [], []>} : vector<8x32xf32>, vector<32x128xf32>, vector<8x128xf32> -> vector<8x128xf32>
    %105 = arith.addf %103, %104 : vector<8x128xf32>
    %106 = arith.negf %105 : vector<8x128xf32>
    %107 = math.exp %106 : vector<8x128xf32>
    %cst_56 = arith.constant 1.000000e+00 : f32
    %108 = vector.broadcast %cst_56 : f32 to vector<8x128xf32>
    %109 = arith.addf %108, %107 : vector<8x128xf32>
    %110 = arith.divf %108, %109 : vector<8x128xf32>
    %111 = vector.extract_strided_slice %110 {offsets = [0, 0], sizes = [8, 32], strides = [1, 1]} : vector<8x128xf32> to vector<8x32xf32>
    %112 = vector.extract_strided_slice %110 {offsets = [0, 32], sizes = [8, 32], strides = [1, 1]} : vector<8x128xf32> to vector<8x32xf32>
    %113 = vector.extract_strided_slice %110 {offsets = [0, 96], sizes = [8, 32], strides = [1, 1]} : vector<8x128xf32> to vector<8x32xf32>
    %114 = vector.extract_strided_slice %105 {offsets = [0, 64], sizes = [8, 32], strides = [1, 1]} : vector<8x128xf32> to vector<8x32xf32>
    %115 = math.tanh %114 : vector<8x32xf32>
    %116 = arith.mulf %112, %69 : vector<8x32xf32>
    %117 = arith.mulf %111, %115 : vector<8x32xf32>
    %118 = arith.addf %116, %117 : vector<8x32xf32>
    %119 = math.tanh %118 : vector<8x32xf32>
    %120 = arith.mulf %113, %119 : vector<8x32xf32>
    %121 = arith.index_cast %100 : i32 to index
    %c0_57 = arith.constant 0 : index
    %c0_58 = arith.constant 0 : index
    %122 = vector.load %arg9[%121, %c0_57, %c0_58] : memref<8x8x32xf32, #tpu.memory_space<vmem>>, vector<1x8x32xf32>
    %123 = vector.shape_cast %122 : vector<1x8x32xf32> to vector<8x32xf32>
    %124 = vector.shape_cast %120 : vector<8x32xf32> to vector<1x8x32xf32>
    tpu.vector_store %arg9[%121, %c0_57, %c0_58], %124 {strides = array<i32>} : memref<8x8x32xf32, #tpu.memory_space<vmem>>, vector<1x8x32xf32>,
    %c2_i32 = arith.constant 2 : i32
    %125 = arith.index_cast %c2_i32 : i32 to index
    %c0_59 = arith.constant 0 : index
    %c0_60 = arith.constant 0 : index
    %126 = vector.load %arg14[%125, %c0_59, %c0_60] : memref<8x8x128xf32, #tpu.memory_space<vmem>>, vector<1x8x128xf32>
    %127 = vector.shape_cast %126 : vector<1x8x128xf32> to vector<8x128xf32>
    %cst_61 = arith.constant dense<0.000000e+00> : vector<8x128xf32>
    %128 = tpu.matmul %95, %21, %cst_61 {dimension_numbers = #tpu.dot_dimension_numbers<[1], [0], [0], [1], [0, 0, 1, 1], [], []>} : vector<8x32xf32>, vector<32x128xf32>, vector<8x128xf32> -> vector<8x128xf32>
    %129 = arith.addf %127, %128 : vector<8x128xf32>
    %130 = arith.negf %129 : vector<8x128xf32>
    %131 = math.exp %130 : vector<8x128xf32>
    %cst_62 = arith.constant 1.000000e+00 : f32
    %132 = vector.broadcast %cst_62 : f32 to vector<8x128xf32>
    %133 = arith.addf %132, %131 : vector<8x128xf32>
    %134 = arith.divf %132, %133 : vector<8x128xf32>
    %135 = vector.extract_strided_slice %134 {offsets = [0, 0], sizes = [8, 32], strides = [1, 1]} : vector<8x128xf32> to vector<8x32xf32>
    %136 = vector.extract_strided_slice %134 {offsets = [0, 32], sizes = [8, 32], strides = [1, 1]} : vector<8x128xf32> to vector<8x32xf32>
    %137 = vector.extract_strided_slice %134 {offsets = [0, 96], sizes = [8, 32], strides = [1, 1]} : vector<8x128xf32> to vector<8x32xf32>
    %138 = vector.extract_strided_slice %129 {offsets = [0, 64], sizes = [8, 32], strides = [1, 1]} : vector<8x128xf32> to vector<8x32xf32>
    %139 = math.tanh %138 : vector<8x32xf32>
    %140 = arith.mulf %136, %93 : vector<8x32xf32>
    %141 = arith.mulf %135, %139 : vector<8x32xf32>
    %142 = arith.addf %140, %141 : vector<8x32xf32>
    %143 = math.tanh %142 : vector<8x32xf32>
    %144 = arith.mulf %137, %143 : vector<8x32xf32>
    %145 = arith.index_cast %c2_i32 : i32 to index
    %c0_63 = arith.constant 0 : index
    %c0_64 = arith.constant 0 : index
    %146 = vector.load %arg8[%145, %c0_63, %c0_64] : memref<8x8x32xf32, #tpu.memory_space<vmem>>, vector<1x8x32xf32>
    %147 = vector.shape_cast %146 : vector<1x8x32xf32> to vector<8x32xf32>
    %148 = vector.shape_cast %144 : vector<8x32xf32> to vector<1x8x32xf32>
    tpu.vector_store %arg8[%145, %c0_63, %c0_64], %148 {strides = array<i32>} : memref<8x8x32xf32, #tpu.memory_space<vmem>>, vector<1x8x32xf32>,
    %c7_i32_65 = arith.constant 7 : i32
    %149 = arith.subi %c7_i32_65, %c2_i32 : i32
    %150 = arith.index_cast %149 : i32 to index
    %c0_66 = arith.constant 0 : index
    %c0_67 = arith.constant 0 : index
    %151 = vector.load %arg15[%150, %c0_66, %c0_67] : memref<8x8x128xf32, #tpu.memory_space<vmem>>, vector<1x8x128xf32>
    %152 = vector.shape_cast %151 : vector<1x8x128xf32> to vector<8x128xf32>
    %cst_68 = arith.constant dense<0.000000e+00> : vector<8x128xf32>
    %153 = tpu.matmul %120, %22, %cst_68 {dimension_numbers = #tpu.dot_dimension_numbers<[1], [0], [0], [1], [0, 0, 1, 1], [], []>} : vector<8x32xf32>, vector<32x128xf32>, vector<8x128xf32> -> vector<8x128xf32>
    %154 = arith.addf %152, %153 : vector<8x128xf32>
    %155 = arith.negf %154 : vector<8x128xf32>
    %156 = math.exp %155 : vector<8x128xf32>
    %cst_69 = arith.constant 1.000000e+00 : f32
    %157 = vector.broadcast %cst_69 : f32 to vector<8x128xf32>
    %158 = arith.addf %157, %156 : vector<8x128xf32>
    %159 = arith.divf %157, %158 : vector<8x128xf32>
    %160 = vector.extract_strided_slice %159 {offsets = [0, 0], sizes = [8, 32], strides = [1, 1]} : vector<8x128xf32> to vector<8x32xf32>
    %161 = vector.extract_strided_slice %159 {offsets = [0, 32], sizes = [8, 32], strides = [1, 1]} : vector<8x128xf32> to vector<8x32xf32>
    %162 = vector.extract_strided_slice %159 {offsets = [0, 96], sizes = [8, 32], strides = [1, 1]} : vector<8x128xf32> to vector<8x32xf32>
    %163 = vector.extract_strided_slice %154 {offsets = [0, 64], sizes = [8, 32], strides = [1, 1]} : vector<8x128xf32> to vector<8x32xf32>
    %164 = math.tanh %163 : vector<8x32xf32>
    %165 = arith.mulf %161, %118 : vector<8x32xf32>
    %166 = arith.mulf %160, %164 : vector<8x32xf32>
    %167 = arith.addf %165, %166 : vector<8x32xf32>
    %168 = math.tanh %167 : vector<8x32xf32>
    %169 = arith.mulf %162, %168 : vector<8x32xf32>
    %170 = arith.index_cast %149 : i32 to index
    %c0_70 = arith.constant 0 : index
    %c0_71 = arith.constant 0 : index
    %171 = vector.load %arg9[%170, %c0_70, %c0_71] : memref<8x8x32xf32, #tpu.memory_space<vmem>>, vector<1x8x32xf32>
    %172 = vector.shape_cast %171 : vector<1x8x32xf32> to vector<8x32xf32>
    %173 = vector.shape_cast %169 : vector<8x32xf32> to vector<1x8x32xf32>
    tpu.vector_store %arg9[%170, %c0_70, %c0_71], %173 {strides = array<i32>} : memref<8x8x32xf32, #tpu.memory_space<vmem>>, vector<1x8x32xf32>,
    %c3_i32 = arith.constant 3 : i32
    %174 = arith.index_cast %c3_i32 : i32 to index
    %c0_72 = arith.constant 0 : index
    %c0_73 = arith.constant 0 : index
    %175 = vector.load %arg14[%174, %c0_72, %c0_73] : memref<8x8x128xf32, #tpu.memory_space<vmem>>, vector<1x8x128xf32>
    %176 = vector.shape_cast %175 : vector<1x8x128xf32> to vector<8x128xf32>
    %cst_74 = arith.constant dense<0.000000e+00> : vector<8x128xf32>
    %177 = tpu.matmul %144, %21, %cst_74 {dimension_numbers = #tpu.dot_dimension_numbers<[1], [0], [0], [1], [0, 0, 1, 1], [], []>} : vector<8x32xf32>, vector<32x128xf32>, vector<8x128xf32> -> vector<8x128xf32>
    %178 = arith.addf %176, %177 : vector<8x128xf32>
    %179 = arith.negf %178 : vector<8x128xf32>
    %180 = math.exp %179 : vector<8x128xf32>
    %cst_75 = arith.constant 1.000000e+00 : f32
    %181 = vector.broadcast %cst_75 : f32 to vector<8x128xf32>
    %182 = arith.addf %181, %180 : vector<8x128xf32>
    %183 = arith.divf %181, %182 : vector<8x128xf32>
    %184 = vector.extract_strided_slice %183 {offsets = [0, 0], sizes = [8, 32], strides = [1, 1]} : vector<8x128xf32> to vector<8x32xf32>
    %185 = vector.extract_strided_slice %183 {offsets = [0, 32], sizes = [8, 32], strides = [1, 1]} : vector<8x128xf32> to vector<8x32xf32>
    %186 = vector.extract_strided_slice %183 {offsets = [0, 96], sizes = [8, 32], strides = [1, 1]} : vector<8x128xf32> to vector<8x32xf32>
    %187 = vector.extract_strided_slice %178 {offsets = [0, 64], sizes = [8, 32], strides = [1, 1]} : vector<8x128xf32> to vector<8x32xf32>
    %188 = math.tanh %187 : vector<8x32xf32>
    %189 = arith.mulf %185, %142 : vector<8x32xf32>
    %190 = arith.mulf %184, %188 : vector<8x32xf32>
    %191 = arith.addf %189, %190 : vector<8x32xf32>
    %192 = math.tanh %191 : vector<8x32xf32>
    %193 = arith.mulf %186, %192 : vector<8x32xf32>
    %194 = arith.index_cast %c3_i32 : i32 to index
    %c0_76 = arith.constant 0 : index
    %c0_77 = arith.constant 0 : index
    %195 = vector.load %arg8[%194, %c0_76, %c0_77] : memref<8x8x32xf32, #tpu.memory_space<vmem>>, vector<1x8x32xf32>
    %196 = vector.shape_cast %195 : vector<1x8x32xf32> to vector<8x32xf32>
    %197 = vector.shape_cast %193 : vector<8x32xf32> to vector<1x8x32xf32>
    tpu.vector_store %arg8[%194, %c0_76, %c0_77], %197 {strides = array<i32>} : memref<8x8x32xf32, #tpu.memory_space<vmem>>, vector<1x8x32xf32>,
    %c7_i32_78 = arith.constant 7 : i32
    %198 = arith.subi %c7_i32_78, %c3_i32 : i32
    %199 = arith.index_cast %198 : i32 to index
    %c0_79 = arith.constant 0 : index
    %c0_80 = arith.constant 0 : index
    %200 = vector.load %arg15[%199, %c0_79, %c0_80] : memref<8x8x128xf32, #tpu.memory_space<vmem>>, vector<1x8x128xf32>
    %201 = vector.shape_cast %200 : vector<1x8x128xf32> to vector<8x128xf32>
    %cst_81 = arith.constant dense<0.000000e+00> : vector<8x128xf32>
    %202 = tpu.matmul %169, %22, %cst_81 {dimension_numbers = #tpu.dot_dimension_numbers<[1], [0], [0], [1], [0, 0, 1, 1], [], []>} : vector<8x32xf32>, vector<32x128xf32>, vector<8x128xf32> -> vector<8x128xf32>
    %203 = arith.addf %201, %202 : vector<8x128xf32>
    %204 = arith.negf %203 : vector<8x128xf32>
    %205 = math.exp %204 : vector<8x128xf32>
    %cst_82 = arith.constant 1.000000e+00 : f32
    %206 = vector.broadcast %cst_82 : f32 to vector<8x128xf32>
    %207 = arith.addf %206, %205 : vector<8x128xf32>
    %208 = arith.divf %206, %207 : vector<8x128xf32>
    %209 = vector.extract_strided_slice %208 {offsets = [0, 0], sizes = [8, 32], strides = [1, 1]} : vector<8x128xf32> to vector<8x32xf32>
    %210 = vector.extract_strided_slice %208 {offsets = [0, 32], sizes = [8, 32], strides = [1, 1]} : vector<8x128xf32> to vector<8x32xf32>
    %211 = vector.extract_strided_slice %208 {offsets = [0, 96], sizes = [8, 32], strides = [1, 1]} : vector<8x128xf32> to vector<8x32xf32>
    %212 = vector.extract_strided_slice %203 {offsets = [0, 64], sizes = [8, 32], strides = [1, 1]} : vector<8x128xf32> to vector<8x32xf32>
    %213 = math.tanh %212 : vector<8x32xf32>
    %214 = arith.mulf %210, %167 : vector<8x32xf32>
    %215 = arith.mulf %209, %213 : vector<8x32xf32>
    %216 = arith.addf %214, %215 : vector<8x32xf32>
    %217 = math.tanh %216 : vector<8x32xf32>
    %218 = arith.mulf %211, %217 : vector<8x32xf32>
    %219 = arith.index_cast %198 : i32 to index
    %c0_83 = arith.constant 0 : index
    %c0_84 = arith.constant 0 : index
    %220 = vector.load %arg9[%219, %c0_83, %c0_84] : memref<8x8x32xf32, #tpu.memory_space<vmem>>, vector<1x8x32xf32>
    %221 = vector.shape_cast %220 : vector<1x8x32xf32> to vector<8x32xf32>
    %222 = vector.shape_cast %218 : vector<8x32xf32> to vector<1x8x32xf32>
    tpu.vector_store %arg9[%219, %c0_83, %c0_84], %222 {strides = array<i32>} : memref<8x8x32xf32, #tpu.memory_space<vmem>>, vector<1x8x32xf32>,
    %c4_i32 = arith.constant 4 : i32
    %223 = arith.index_cast %c4_i32 : i32 to index
    %c0_85 = arith.constant 0 : index
    %c0_86 = arith.constant 0 : index
    %224 = vector.load %arg14[%223, %c0_85, %c0_86] : memref<8x8x128xf32, #tpu.memory_space<vmem>>, vector<1x8x128xf32>
    %225 = vector.shape_cast %224 : vector<1x8x128xf32> to vector<8x128xf32>
    %cst_87 = arith.constant dense<0.000000e+00> : vector<8x128xf32>
    %226 = tpu.matmul %193, %21, %cst_87 {dimension_numbers = #tpu.dot_dimension_numbers<[1], [0], [0], [1], [0, 0, 1, 1], [], []>} : vector<8x32xf32>, vector<32x128xf32>, vector<8x128xf32> -> vector<8x128xf32>
    %227 = arith.addf %225, %226 : vector<8x128xf32>
    %228 = arith.negf %227 : vector<8x128xf32>
    %229 = math.exp %228 : vector<8x128xf32>
    %cst_88 = arith.constant 1.000000e+00 : f32
    %230 = vector.broadcast %cst_88 : f32 to vector<8x128xf32>
    %231 = arith.addf %230, %229 : vector<8x128xf32>
    %232 = arith.divf %230, %231 : vector<8x128xf32>
    %233 = vector.extract_strided_slice %232 {offsets = [0, 0], sizes = [8, 32], strides = [1, 1]} : vector<8x128xf32> to vector<8x32xf32>
    %234 = vector.extract_strided_slice %232 {offsets = [0, 32], sizes = [8, 32], strides = [1, 1]} : vector<8x128xf32> to vector<8x32xf32>
    %235 = vector.extract_strided_slice %232 {offsets = [0, 96], sizes = [8, 32], strides = [1, 1]} : vector<8x128xf32> to vector<8x32xf32>
    %236 = vector.extract_strided_slice %227 {offsets = [0, 64], sizes = [8, 32], strides = [1, 1]} : vector<8x128xf32> to vector<8x32xf32>
    %237 = math.tanh %236 : vector<8x32xf32>
    %238 = arith.mulf %234, %191 : vector<8x32xf32>
    %239 = arith.mulf %233, %237 : vector<8x32xf32>
    %240 = arith.addf %238, %239 : vector<8x32xf32>
    %241 = math.tanh %240 : vector<8x32xf32>
    %242 = arith.mulf %235, %241 : vector<8x32xf32>
    %243 = arith.index_cast %c4_i32 : i32 to index
    %c0_89 = arith.constant 0 : index
    %c0_90 = arith.constant 0 : index
    %244 = vector.load %arg8[%243, %c0_89, %c0_90] : memref<8x8x32xf32, #tpu.memory_space<vmem>>, vector<1x8x32xf32>
    %245 = vector.shape_cast %244 : vector<1x8x32xf32> to vector<8x32xf32>
    %246 = vector.shape_cast %242 : vector<8x32xf32> to vector<1x8x32xf32>
    tpu.vector_store %arg8[%243, %c0_89, %c0_90], %246 {strides = array<i32>} : memref<8x8x32xf32, #tpu.memory_space<vmem>>, vector<1x8x32xf32>,
    %c7_i32_91 = arith.constant 7 : i32
    %247 = arith.subi %c7_i32_91, %c4_i32 : i32
    %248 = arith.index_cast %247 : i32 to index
    %c0_92 = arith.constant 0 : index
    %c0_93 = arith.constant 0 : index
    %249 = vector.load %arg15[%248, %c0_92, %c0_93] : memref<8x8x128xf32, #tpu.memory_space<vmem>>, vector<1x8x128xf32>
    %250 = vector.shape_cast %249 : vector<1x8x128xf32> to vector<8x128xf32>
    %cst_94 = arith.constant dense<0.000000e+00> : vector<8x128xf32>
    %251 = tpu.matmul %218, %22, %cst_94 {dimension_numbers = #tpu.dot_dimension_numbers<[1], [0], [0], [1], [0, 0, 1, 1], [], []>} : vector<8x32xf32>, vector<32x128xf32>, vector<8x128xf32> -> vector<8x128xf32>
    %252 = arith.addf %250, %251 : vector<8x128xf32>
    %253 = arith.negf %252 : vector<8x128xf32>
    %254 = math.exp %253 : vector<8x128xf32>
    %cst_95 = arith.constant 1.000000e+00 : f32
    %255 = vector.broadcast %cst_95 : f32 to vector<8x128xf32>
    %256 = arith.addf %255, %254 : vector<8x128xf32>
    %257 = arith.divf %255, %256 : vector<8x128xf32>
    %258 = vector.extract_strided_slice %257 {offsets = [0, 0], sizes = [8, 32], strides = [1, 1]} : vector<8x128xf32> to vector<8x32xf32>
    %259 = vector.extract_strided_slice %257 {offsets = [0, 32], sizes = [8, 32], strides = [1, 1]} : vector<8x128xf32> to vector<8x32xf32>
    %260 = vector.extract_strided_slice %257 {offsets = [0, 96], sizes = [8, 32], strides = [1, 1]} : vector<8x128xf32> to vector<8x32xf32>
    %261 = vector.extract_strided_slice %252 {offsets = [0, 64], sizes = [8, 32], strides = [1, 1]} : vector<8x128xf32> to vector<8x32xf32>
    %262 = math.tanh %261 : vector<8x32xf32>
    %263 = arith.mulf %259, %216 : vector<8x32xf32>
    %264 = arith.mulf %258, %262 : vector<8x32xf32>
    %265 = arith.addf %263, %264 : vector<8x32xf32>
    %266 = math.tanh %265 : vector<8x32xf32>
    %267 = arith.mulf %260, %266 : vector<8x32xf32>
    %268 = arith.index_cast %247 : i32 to index
    %c0_96 = arith.constant 0 : index
    %c0_97 = arith.constant 0 : index
    %269 = vector.load %arg9[%268, %c0_96, %c0_97] : memref<8x8x32xf32, #tpu.memory_space<vmem>>, vector<1x8x32xf32>
    %270 = vector.shape_cast %269 : vector<1x8x32xf32> to vector<8x32xf32>
    %271 = vector.shape_cast %267 : vector<8x32xf32> to vector<1x8x32xf32>
    tpu.vector_store %arg9[%268, %c0_96, %c0_97], %271 {strides = array<i32>} : memref<8x8x32xf32, #tpu.memory_space<vmem>>, vector<1x8x32xf32>,
    %c5_i32 = arith.constant 5 : i32
    %272 = arith.index_cast %c5_i32 : i32 to index
    %c0_98 = arith.constant 0 : index
    %c0_99 = arith.constant 0 : index
    %273 = vector.load %arg14[%272, %c0_98, %c0_99] : memref<8x8x128xf32, #tpu.memory_space<vmem>>, vector<1x8x128xf32>
    %274 = vector.shape_cast %273 : vector<1x8x128xf32> to vector<8x128xf32>
    %cst_100 = arith.constant dense<0.000000e+00> : vector<8x128xf32>
    %275 = tpu.matmul %242, %21, %cst_100 {dimension_numbers = #tpu.dot_dimension_numbers<[1], [0], [0], [1], [0, 0, 1, 1], [], []>} : vector<8x32xf32>, vector<32x128xf32>, vector<8x128xf32> -> vector<8x128xf32>
    %276 = arith.addf %274, %275 : vector<8x128xf32>
    %277 = arith.negf %276 : vector<8x128xf32>
    %278 = math.exp %277 : vector<8x128xf32>
    %cst_101 = arith.constant 1.000000e+00 : f32
    %279 = vector.broadcast %cst_101 : f32 to vector<8x128xf32>
    %280 = arith.addf %279, %278 : vector<8x128xf32>
    %281 = arith.divf %279, %280 : vector<8x128xf32>
    %282 = vector.extract_strided_slice %281 {offsets = [0, 0], sizes = [8, 32], strides = [1, 1]} : vector<8x128xf32> to vector<8x32xf32>
    %283 = vector.extract_strided_slice %281 {offsets = [0, 32], sizes = [8, 32], strides = [1, 1]} : vector<8x128xf32> to vector<8x32xf32>
    %284 = vector.extract_strided_slice %281 {offsets = [0, 96], sizes = [8, 32], strides = [1, 1]} : vector<8x128xf32> to vector<8x32xf32>
    %285 = vector.extract_strided_slice %276 {offsets = [0, 64], sizes = [8, 32], strides = [1, 1]} : vector<8x128xf32> to vector<8x32xf32>
    %286 = math.tanh %285 : vector<8x32xf32>
    %287 = arith.mulf %283, %240 : vector<8x32xf32>
    %288 = arith.mulf %282, %286 : vector<8x32xf32>
    %289 = arith.addf %287, %288 : vector<8x32xf32>
    %290 = math.tanh %289 : vector<8x32xf32>
    %291 = arith.mulf %284, %290 : vector<8x32xf32>
    %292 = arith.index_cast %c5_i32 : i32 to index
    %c0_102 = arith.constant 0 : index
    %c0_103 = arith.constant 0 : index
    %293 = vector.load %arg8[%292, %c0_102, %c0_103] : memref<8x8x32xf32, #tpu.memory_space<vmem>>, vector<1x8x32xf32>
    %294 = vector.shape_cast %293 : vector<1x8x32xf32> to vector<8x32xf32>
    %295 = vector.shape_cast %291 : vector<8x32xf32> to vector<1x8x32xf32>
    tpu.vector_store %arg8[%292, %c0_102, %c0_103], %295 {strides = array<i32>} : memref<8x8x32xf32, #tpu.memory_space<vmem>>, vector<1x8x32xf32>,
    %c7_i32_104 = arith.constant 7 : i32
    %296 = arith.subi %c7_i32_104, %c5_i32 : i32
    %297 = arith.index_cast %296 : i32 to index
    %c0_105 = arith.constant 0 : index
    %c0_106 = arith.constant 0 : index
    %298 = vector.load %arg15[%297, %c0_105, %c0_106] : memref<8x8x128xf32, #tpu.memory_space<vmem>>, vector<1x8x128xf32>
    %299 = vector.shape_cast %298 : vector<1x8x128xf32> to vector<8x128xf32>
    %cst_107 = arith.constant dense<0.000000e+00> : vector<8x128xf32>
    %300 = tpu.matmul %267, %22, %cst_107 {dimension_numbers = #tpu.dot_dimension_numbers<[1], [0], [0], [1], [0, 0, 1, 1], [], []>} : vector<8x32xf32>, vector<32x128xf32>, vector<8x128xf32> -> vector<8x128xf32>
    %301 = arith.addf %299, %300 : vector<8x128xf32>
    %302 = arith.negf %301 : vector<8x128xf32>
    %303 = math.exp %302 : vector<8x128xf32>
    %cst_108 = arith.constant 1.000000e+00 : f32
    %304 = vector.broadcast %cst_108 : f32 to vector<8x128xf32>
    %305 = arith.addf %304, %303 : vector<8x128xf32>
    %306 = arith.divf %304, %305 : vector<8x128xf32>
    %307 = vector.extract_strided_slice %306 {offsets = [0, 0], sizes = [8, 32], strides = [1, 1]} : vector<8x128xf32> to vector<8x32xf32>
    %308 = vector.extract_strided_slice %306 {offsets = [0, 32], sizes = [8, 32], strides = [1, 1]} : vector<8x128xf32> to vector<8x32xf32>
    %309 = vector.extract_strided_slice %306 {offsets = [0, 96], sizes = [8, 32], strides = [1, 1]} : vector<8x128xf32> to vector<8x32xf32>
    %310 = vector.extract_strided_slice %301 {offsets = [0, 64], sizes = [8, 32], strides = [1, 1]} : vector<8x128xf32> to vector<8x32xf32>
    %311 = math.tanh %310 : vector<8x32xf32>
    %312 = arith.mulf %308, %265 : vector<8x32xf32>
    %313 = arith.mulf %307, %311 : vector<8x32xf32>
    %314 = arith.addf %312, %313 : vector<8x32xf32>
    %315 = math.tanh %314 : vector<8x32xf32>
    %316 = arith.mulf %309, %315 : vector<8x32xf32>
    %317 = arith.index_cast %296 : i32 to index
    %c0_109 = arith.constant 0 : index
    %c0_110 = arith.constant 0 : index
    %318 = vector.load %arg9[%317, %c0_109, %c0_110] : memref<8x8x32xf32, #tpu.memory_space<vmem>>, vector<1x8x32xf32>
    %319 = vector.shape_cast %318 : vector<1x8x32xf32> to vector<8x32xf32>
    %320 = vector.shape_cast %316 : vector<8x32xf32> to vector<1x8x32xf32>
    tpu.vector_store %arg9[%317, %c0_109, %c0_110], %320 {strides = array<i32>} : memref<8x8x32xf32, #tpu.memory_space<vmem>>, vector<1x8x32xf32>,
    %c6_i32 = arith.constant 6 : i32
    %321 = arith.index_cast %c6_i32 : i32 to index
    %c0_111 = arith.constant 0 : index
    %c0_112 = arith.constant 0 : index
    %322 = vector.load %arg14[%321, %c0_111, %c0_112] : memref<8x8x128xf32, #tpu.memory_space<vmem>>, vector<1x8x128xf32>
    %323 = vector.shape_cast %322 : vector<1x8x128xf32> to vector<8x128xf32>
    %cst_113 = arith.constant dense<0.000000e+00> : vector<8x128xf32>
    %324 = tpu.matmul %291, %21, %cst_113 {dimension_numbers = #tpu.dot_dimension_numbers<[1], [0], [0], [1], [0, 0, 1, 1], [], []>} : vector<8x32xf32>, vector<32x128xf32>, vector<8x128xf32> -> vector<8x128xf32>
    %325 = arith.addf %323, %324 : vector<8x128xf32>
    %326 = arith.negf %325 : vector<8x128xf32>
    %327 = math.exp %326 : vector<8x128xf32>
    %cst_114 = arith.constant 1.000000e+00 : f32
    %328 = vector.broadcast %cst_114 : f32 to vector<8x128xf32>
    %329 = arith.addf %328, %327 : vector<8x128xf32>
    %330 = arith.divf %328, %329 : vector<8x128xf32>
    %331 = vector.extract_strided_slice %330 {offsets = [0, 0], sizes = [8, 32], strides = [1, 1]} : vector<8x128xf32> to vector<8x32xf32>
    %332 = vector.extract_strided_slice %330 {offsets = [0, 32], sizes = [8, 32], strides = [1, 1]} : vector<8x128xf32> to vector<8x32xf32>
    %333 = vector.extract_strided_slice %330 {offsets = [0, 96], sizes = [8, 32], strides = [1, 1]} : vector<8x128xf32> to vector<8x32xf32>
    %334 = vector.extract_strided_slice %325 {offsets = [0, 64], sizes = [8, 32], strides = [1, 1]} : vector<8x128xf32> to vector<8x32xf32>
    %335 = math.tanh %334 : vector<8x32xf32>
    %336 = arith.mulf %332, %289 : vector<8x32xf32>
    %337 = arith.mulf %331, %335 : vector<8x32xf32>
    %338 = arith.addf %336, %337 : vector<8x32xf32>
    %339 = math.tanh %338 : vector<8x32xf32>
    %340 = arith.mulf %333, %339 : vector<8x32xf32>
    %341 = arith.index_cast %c6_i32 : i32 to index
    %c0_115 = arith.constant 0 : index
    %c0_116 = arith.constant 0 : index
    %342 = vector.load %arg8[%341, %c0_115, %c0_116] : memref<8x8x32xf32, #tpu.memory_space<vmem>>, vector<1x8x32xf32>
    %343 = vector.shape_cast %342 : vector<1x8x32xf32> to vector<8x32xf32>
    %344 = vector.shape_cast %340 : vector<8x32xf32> to vector<1x8x32xf32>
    tpu.vector_store %arg8[%341, %c0_115, %c0_116], %344 {strides = array<i32>} : memref<8x8x32xf32, #tpu.memory_space<vmem>>, vector<1x8x32xf32>,
    %c7_i32_117 = arith.constant 7 : i32
    %345 = arith.subi %c7_i32_117, %c6_i32 : i32
    %346 = arith.index_cast %345 : i32 to index
    %c0_118 = arith.constant 0 : index
    %c0_119 = arith.constant 0 : index
    %347 = vector.load %arg15[%346, %c0_118, %c0_119] : memref<8x8x128xf32, #tpu.memory_space<vmem>>, vector<1x8x128xf32>
    %348 = vector.shape_cast %347 : vector<1x8x128xf32> to vector<8x128xf32>
    %cst_120 = arith.constant dense<0.000000e+00> : vector<8x128xf32>
    %349 = tpu.matmul %316, %22, %cst_120 {dimension_numbers = #tpu.dot_dimension_numbers<[1], [0], [0], [1], [0, 0, 1, 1], [], []>} : vector<8x32xf32>, vector<32x128xf32>, vector<8x128xf32> -> vector<8x128xf32>
    %350 = arith.addf %348, %349 : vector<8x128xf32>
    %351 = arith.negf %350 : vector<8x128xf32>
    %352 = math.exp %351 : vector<8x128xf32>
    %cst_121 = arith.constant 1.000000e+00 : f32
    %353 = vector.broadcast %cst_121 : f32 to vector<8x128xf32>
    %354 = arith.addf %353, %352 : vector<8x128xf32>
    %355 = arith.divf %353, %354 : vector<8x128xf32>
    %356 = vector.extract_strided_slice %355 {offsets = [0, 0], sizes = [8, 32], strides = [1, 1]} : vector<8x128xf32> to vector<8x32xf32>
    %357 = vector.extract_strided_slice %355 {offsets = [0, 32], sizes = [8, 32], strides = [1, 1]} : vector<8x128xf32> to vector<8x32xf32>
    %358 = vector.extract_strided_slice %355 {offsets = [0, 96], sizes = [8, 32], strides = [1, 1]} : vector<8x128xf32> to vector<8x32xf32>
    %359 = vector.extract_strided_slice %350 {offsets = [0, 64], sizes = [8, 32], strides = [1, 1]} : vector<8x128xf32> to vector<8x32xf32>
    %360 = math.tanh %359 : vector<8x32xf32>
    %361 = arith.mulf %357, %314 : vector<8x32xf32>
    %362 = arith.mulf %356, %360 : vector<8x32xf32>
    %363 = arith.addf %361, %362 : vector<8x32xf32>
    %364 = math.tanh %363 : vector<8x32xf32>
    %365 = arith.mulf %358, %364 : vector<8x32xf32>
    %366 = arith.index_cast %345 : i32 to index
    %c0_122 = arith.constant 0 : index
    %c0_123 = arith.constant 0 : index
    %367 = vector.load %arg9[%366, %c0_122, %c0_123] : memref<8x8x32xf32, #tpu.memory_space<vmem>>, vector<1x8x32xf32>
    %368 = vector.shape_cast %367 : vector<1x8x32xf32> to vector<8x32xf32>
    %369 = vector.shape_cast %365 : vector<8x32xf32> to vector<1x8x32xf32>
    tpu.vector_store %arg9[%366, %c0_122, %c0_123], %369 {strides = array<i32>} : memref<8x8x32xf32, #tpu.memory_space<vmem>>, vector<1x8x32xf32>,
    %c7_i32_124 = arith.constant 7 : i32
    %370 = arith.index_cast %c7_i32_124 : i32 to index
    %c0_125 = arith.constant 0 : index
    %c0_126 = arith.constant 0 : index
    %371 = vector.load %arg14[%370, %c0_125, %c0_126] : memref<8x8x128xf32, #tpu.memory_space<vmem>>, vector<1x8x128xf32>
    %372 = vector.shape_cast %371 : vector<1x8x128xf32> to vector<8x128xf32>
    %cst_127 = arith.constant dense<0.000000e+00> : vector<8x128xf32>
    %373 = tpu.matmul %340, %21, %cst_127 {dimension_numbers = #tpu.dot_dimension_numbers<[1], [0], [0], [1], [0, 0, 1, 1], [], []>} : vector<8x32xf32>, vector<32x128xf32>, vector<8x128xf32> -> vector<8x128xf32>
    %374 = arith.addf %372, %373 : vector<8x128xf32>
    %375 = arith.negf %374 : vector<8x128xf32>
    %376 = math.exp %375 : vector<8x128xf32>
    %cst_128 = arith.constant 1.000000e+00 : f32
    %377 = vector.broadcast %cst_128 : f32 to vector<8x128xf32>
    %378 = arith.addf %377, %376 : vector<8x128xf32>
    %379 = arith.divf %377, %378 : vector<8x128xf32>
    %380 = vector.extract_strided_slice %379 {offsets = [0, 0], sizes = [8, 32], strides = [1, 1]} : vector<8x128xf32> to vector<8x32xf32>
    %381 = vector.extract_strided_slice %379 {offsets = [0, 32], sizes = [8, 32], strides = [1, 1]} : vector<8x128xf32> to vector<8x32xf32>
    %382 = vector.extract_strided_slice %379 {offsets = [0, 96], sizes = [8, 32], strides = [1, 1]} : vector<8x128xf32> to vector<8x32xf32>
    %383 = vector.extract_strided_slice %374 {offsets = [0, 64], sizes = [8, 32], strides = [1, 1]} : vector<8x128xf32> to vector<8x32xf32>
    %384 = math.tanh %383 : vector<8x32xf32>
    %385 = arith.mulf %381, %338 : vector<8x32xf32>
    %386 = arith.mulf %380, %384 : vector<8x32xf32>
    %387 = arith.addf %385, %386 : vector<8x32xf32>
    %388 = math.tanh %387 : vector<8x32xf32>
    %389 = arith.mulf %382, %388 : vector<8x32xf32>
    %390 = arith.index_cast %c7_i32_124 : i32 to index
    %c0_129 = arith.constant 0 : index
    %c0_130 = arith.constant 0 : index
    %391 = vector.load %arg8[%390, %c0_129, %c0_130] : memref<8x8x32xf32, #tpu.memory_space<vmem>>, vector<1x8x32xf32>
    %392 = vector.shape_cast %391 : vector<1x8x32xf32> to vector<8x32xf32>
    %393 = vector.shape_cast %389 : vector<8x32xf32> to vector<1x8x32xf32>
    tpu.vector_store %arg8[%390, %c0_129, %c0_130], %393 {strides = array<i32>} : memref<8x8x32xf32, #tpu.memory_space<vmem>>, vector<1x8x32xf32>,
    %c7_i32_131 = arith.constant 7 : i32
    %394 = arith.subi %c7_i32_131, %c7_i32_124 : i32
    %395 = arith.index_cast %394 : i32 to index
    %c0_132 = arith.constant 0 : index
    %c0_133 = arith.constant 0 : index
    %396 = vector.load %arg15[%395, %c0_132, %c0_133] : memref<8x8x128xf32, #tpu.memory_space<vmem>>, vector<1x8x128xf32>
    %397 = vector.shape_cast %396 : vector<1x8x128xf32> to vector<8x128xf32>
    %cst_134 = arith.constant dense<0.000000e+00> : vector<8x128xf32>
    %398 = tpu.matmul %365, %22, %cst_134 {dimension_numbers = #tpu.dot_dimension_numbers<[1], [0], [0], [1], [0, 0, 1, 1], [], []>} : vector<8x32xf32>, vector<32x128xf32>, vector<8x128xf32> -> vector<8x128xf32>
    %399 = arith.addf %397, %398 : vector<8x128xf32>
    %400 = arith.negf %399 : vector<8x128xf32>
    %401 = math.exp %400 : vector<8x128xf32>
    %cst_135 = arith.constant 1.000000e+00 : f32
    %402 = vector.broadcast %cst_135 : f32 to vector<8x128xf32>
    %403 = arith.addf %402, %401 : vector<8x128xf32>
    %404 = arith.divf %402, %403 : vector<8x128xf32>
    %405 = vector.extract_strided_slice %404 {offsets = [0, 0], sizes = [8, 32], strides = [1, 1]} : vector<8x128xf32> to vector<8x32xf32>
    %406 = vector.extract_strided_slice %404 {offsets = [0, 32], sizes = [8, 32], strides = [1, 1]} : vector<8x128xf32> to vector<8x32xf32>
    %407 = vector.extract_strided_slice %404 {offsets = [0, 96], sizes = [8, 32], strides = [1, 1]} : vector<8x128xf32> to vector<8x32xf32>
    %408 = vector.extract_strided_slice %399 {offsets = [0, 64], sizes = [8, 32], strides = [1, 1]} : vector<8x128xf32> to vector<8x32xf32>
    %409 = math.tanh %408 : vector<8x32xf32>
    %410 = arith.mulf %406, %363 : vector<8x32xf32>
    %411 = arith.mulf %405, %409 : vector<8x32xf32>
    %412 = arith.addf %410, %411 : vector<8x32xf32>
    %413 = math.tanh %412 : vector<8x32xf32>
    %414 = arith.mulf %407, %413 : vector<8x32xf32>
    %415 = arith.index_cast %394 : i32 to index
    %c0_136 = arith.constant 0 : index
    %c0_137 = arith.constant 0 : index
    %416 = vector.load %arg9[%415, %c0_136, %c0_137] : memref<8x8x32xf32, #tpu.memory_space<vmem>>, vector<1x8x32xf32>
    %417 = vector.shape_cast %416 : vector<1x8x32xf32> to vector<8x32xf32>
    %418 = vector.shape_cast %414 : vector<8x32xf32> to vector<1x8x32xf32>
    tpu.vector_store %arg9[%415, %c0_136, %c0_137], %418 {strides = array<i32>} : memref<8x8x32xf32, #tpu.memory_space<vmem>>, vector<1x8x32xf32>,
    %c8_i32 = arith.constant 8 : i32
    %c0_138 = arith.constant 0 : index
    %c0_139 = arith.constant 0 : index
    %419 = vector.load %arg10[%c0_138, %c0_139] : memref<8x32xf32, #tpu.memory_space<vmem>>, vector<8x32xf32>
    tpu.vector_store %arg10[%c0_138, %c0_139], %389 {strides = array<i32>} : memref<8x32xf32, #tpu.memory_space<vmem>>, vector<8x32xf32>,
    %c0_140 = arith.constant 0 : index
    %c0_141 = arith.constant 0 : index
    %420 = vector.load %arg11[%c0_140, %c0_141] : memref<8x32xf32, #tpu.memory_space<vmem>>, vector<8x32xf32>
    tpu.vector_store %arg11[%c0_140, %c0_141], %387 {strides = array<i32>} : memref<8x32xf32, #tpu.memory_space<vmem>>, vector<8x32xf32>,
    %c0_142 = arith.constant 0 : index
    %c0_143 = arith.constant 0 : index
    %421 = vector.load %arg12[%c0_142, %c0_143] : memref<8x32xf32, #tpu.memory_space<vmem>>, vector<8x32xf32>
    tpu.vector_store %arg12[%c0_142, %c0_143], %414 {strides = array<i32>} : memref<8x32xf32, #tpu.memory_space<vmem>>, vector<8x32xf32>,
    %c0_144 = arith.constant 0 : index
    %c0_145 = arith.constant 0 : index
    %422 = vector.load %arg13[%c0_144, %c0_145] : memref<8x32xf32, #tpu.memory_space<vmem>>, vector<8x32xf32>
    tpu.vector_store %arg13[%c0_144, %c0_145], %412 {strides = array<i32>} : memref<8x32xf32, #tpu.memory_space<vmem>>, vector<8x32xf32>,
    return
  }
  func.func @transform_0(%arg0: i32) -> (i32, i32, i32) {
    %c0_i32 = arith.constant 0 : i32
    %c0_i32_0 = arith.constant 0 : i32
    %c0_i32_1 = arith.constant 0 : i32
    return %arg0, %c0_i32, %c0_i32_0 : i32, i32, i32
  }
  func.func @transform_1(%arg0: i32) -> (i32, i32) {
    %c0_i32 = arith.constant 0 : i32
    %c0_i32_0 = arith.constant 0 : i32
    %c0_i32_1 = arith.constant 0 : i32
    return %c0_i32, %c0_i32_0 : i32, i32
  }
  func.func @transform_2(%arg0: i32) -> (i32, i32) {
    %c0_i32 = arith.constant 0 : i32
    %c0_i32_0 = arith.constant 0 : i32
    %c0_i32_1 = arith.constant 0 : i32
    return %c0_i32, %c0_i32_0 : i32, i32
  }
  func.func @transform_3(%arg0: i32) -> (i32, i32) {
    %c0_i32 = arith.constant 0 : i32
    %c0_i32_0 = arith.constant 0 : i32
    %c0_i32_1 = arith.constant 0 : i32
    return %c0_i32, %c0_i32_0 : i32, i32
  }
  func.func @transform_4(%arg0: i32) -> (i32, i32) {
    %c0_i32 = arith.constant 0 : i32
    %c0_i32_0 = arith.constant 0 : i32
    %c0_i32_1 = arith.constant 0 : i32
    return %c0_i32, %c0_i32_0 : i32, i32
  }
  func.func @transform_5(%arg0: i32) -> (i32, i32) {
    %c0_i32 = arith.constant 0 : i32
    %c0_i32_0 = arith.constant 0 : i32
    %c0_i32_1 = arith.constant 0 : i32
    return %c0_i32, %c0_i32_0 : i32, i32
  }
  func.func @transform_6(%arg0: i32) -> (i32, i32) {
    %c0_i32 = arith.constant 0 : i32
    %c0_i32_0 = arith.constant 0 : i32
    %c0_i32_1 = arith.constant 0 : i32
    return %c0_i32, %c0_i32_0 : i32, i32
  }
  func.func @transform_7(%arg0: i32) -> (i32, i32, i32) {
    %c0_i32 = arith.constant 0 : i32
    %c0_i32_0 = arith.constant 0 : i32
    %c0_i32_1 = arith.constant 0 : i32
    return %arg0, %c0_i32, %c0_i32_0 : i32, i32, i32
  }
  func.func @transform_8(%arg0: i32) -> (i32, i32, i32) {
    %c0_i32 = arith.constant 0 : i32
    %0 = arith.subi %c0_i32, %arg0 : i32
    %c0_i32_0 = arith.constant 0 : i32
    %c0_i32_1 = arith.constant 0 : i32
    %c0_i32_2 = arith.constant 0 : i32
    return %0, %c0_i32_0, %c0_i32_1 : i32, i32, i32
  }
}

</mosaic_0001>

<bundles_post_ra>
// kernel: tpu_custom_call.1
= control target key start
LH: loop header
LB: loop body
LE: loop exit
PB: predicated region body
PF: predicated region fallthrough
CT: control target
= control target key end

     0   :  { %14 = vsyncpa [#allocation9], 0  ;;  %s2228_s0 = inlined_call_operand.hbm [shape: f32[8,8,16], index: 0, kind: input, shape index: {}]   ;;  %s2229_s1 = inlined_call_operand.hbm [shape: f32[16,128], index: 1, kind: input, shape index: {}]   ;;  %s2230_s2 = inlined_call_operand.hbm [shape: f32[32,128], index: 2, kind: input, shape index: {}]   ;;  %s2231_s3 = inlined_call_operand.hbm [shape: f32[16,128], index: 3, kind: input, shape index: {}]   ;;  %s2232_s4 = inlined_call_operand.hbm [shape: f32[32,128], index: 4, kind: input, shape index: {}]   ;;  %s2233_s5 = inlined_call_operand.vmem [shape: f32[1,128], index: 5, kind: input, shape index: {}]   ;;  %s2234_s6 = inlined_call_operand.vmem [shape: f32[1,128], index: 6, kind: input, shape index: {}]   ;;  %s2235_s7 = inlined_call_operand.hbm [shape: f32[8,8,32], index: 7, kind: output, shape index: {0}]   ;;  %s2236_s8 = inlined_call_operand.hbm [shape: f32[8,8,32], index: 8, kind: output, shape index: {1}]  }
   0x1   :  { %15 = vsyncpa [#allocation12], 0 }
   0x2   :  { %16 = vsyncpa [#allocation15], 0 }
   0x3   :  { %17 = vsyncpa [#allocation10], 0 }
   0x4   :  { %18 = vsyncpa [#allocation19], 0  ;;  %s36_s29 = sshll.u32 %s2229_s1, 4  ;;  %s1832_s30 = smov [#allocation11]   ;;  %s37_s29 = int_to_ptr.hbm [resolvable:$true] %s36_s29 }
   0x5   :  { %s38_s9 = sshll.u32 %s1832_s30, 4  ;;  %s62_s12 = sshll.u32 %s2231_s3, 4  ;;  %s39_s9 = int_to_ptr.vmem [resolvable:$true] %s38_s9  ;;  %s63_s12 = int_to_ptr.hbm [resolvable:$true] %s62_s12 }
   0x6   :  { %s1833_s13 = smov 128   ;;  %s1834_s14 = smov 8  }
   0x7   :  { %44 = dma.hbm_to_vmem [thread:$0]  %s37_s29, 256, %s39_s9, [#allocation12], %s1833_s13, %s1833_s13, %s1834_s14  }
   0x8   :  { %s1835_s15 = smov [#allocation14]   ;;  %s23_s1 = sshll.u32 %s2228_s0, 4  ;;  %s24_s1 = int_to_ptr.hbm [resolvable:$true] %s23_s1 }
   0x9   :  { %s64_s16 = sshll.u32 %s1835_s15, 4  ;;  %s49_s20 = sshll.u32 %s2230_s2, 4  ;;  %s65_s16 = int_to_ptr.vmem [resolvable:$true] %s64_s16  ;;  %s50_s20 = int_to_ptr.hbm [resolvable:$true] %s49_s20 }
   0xa   :  { %70 = dma.hbm_to_vmem [thread:$0]  %s63_s12, 256, %s65_s16, [#allocation15], %s1833_s13, %s1833_s13, %s1834_s14  }
   0xb   :  { %s1836_s21 = smov [#allocation8]   ;;  %s1837_s23 = smov [#allocation13]  }
   0xc   :  { %s25_s22 = sshll.u32 %s1836_s21, 4  ;;  %s51_s0 = sshll.u32 %s1837_s23, 4  ;;  %s26_s22 = int_to_ptr.vmem [resolvable:$true] %s25_s22  ;;  %s52_s0 = int_to_ptr.vmem [resolvable:$true] %s51_s0 }
   0xd   :  { %31 = dma.hbm_to_vmem [thread:$0]  %s24_s1, 1024, %s26_s22, [#allocation9], %s1833_s13, %s1833_s13, %s1834_s14  }
   0xe   :  { %s75_s26 = sshll.u32 %s2232_s4, 4  ;;  %s1838_s2 = smov [#allocation16]   ;;  %s76_s26 = int_to_ptr.hbm [resolvable:$true] %s75_s26 }
   0xf   :  { %57 = dma.hbm_to_vmem [thread:$0]  %s50_s20, 512, %s52_s0, [#allocation12], %s1833_s13, %s1833_s13, %s1834_s14  }
  0x10   :  { %s77_s27 = sshll.u32 %s1838_s2, 4  ;;  %s78_s27 = int_to_ptr.vmem [resolvable:$true] %s77_s27 }
  0x11   :  { %83 = dma.hbm_to_vmem [thread:$0]  %s76_s26, 512, %s78_s27, [#allocation15], %s1833_s13, %s1833_s13, %s1834_s14  }
  0x12   :  { %1822 = dma.done.wait [#allocation9], 1024  }
  0x13   :  { %1823 = vsyncadd [#allocation9], 4294966272 }
  0x14   :  { %1824 = dma.done.wait [#allocation12], 768  }
  0x15   :  { %1825 = vsyncadd [#allocation12], 4294966528 }
  0x16   :  { %1826 = dma.done.wait [#allocation15], 768  }
  0x17   :  { %1827 = vsyncadd [#allocation15], 4294966528  ;;  %vm114_vm0 = vcmask 261120   ;;  %v1839_v0 = vmov 0.0   ;;  %v216_v1 = vld [vmem:[#allocation14 + $0x8] sm:$0xff]  ;;  %v1924_v2 = vld [vmem:[#allocation13 + $0x18] sm:$0xff] }
  0x18   :  { %115 = vst.msk [vmem:[#allocation2] sm:$0xff] %vm114_vm0, %v1839_v0  ;;  %v215_v3 = vld [vmem:[#allocation14] sm:$0xff]  ;;  %259 = vmatpush.msra.mxu1 %v216_v1  ;;  %323 = vmatpush.msra.mxu2 %v1924_v2  ;;  %v1927_v4 = vld [vmem:[#allocation13 + $0x10] sm:$0xff]  ;;  %vm133_vm1 = vcmask 130048   ;;  %v1929_v6 = vld [vmem:[#allocation13 + $0x8] sm:$0xff]  ;;  %s1840_s4 = smov 32  }
  0x19   :  { %116 = vst.msk [vmem:[#allocation3] sm:$0xff] %vm114_vm0, %v1839_v0  ;;  %v207_v5 = vld [vmem:[#allocation8] sm:$0xff]  ;;  %v128_v7 = vld [vmem:[#allocation11 + $0x8] sm:$0xff]  ;;  %v1933_v9 = vld [vmem:[#allocation13] sm:$0xff]  ;;  %s1843_s12 = smov [#allocation17]   ;;  %s1419_s18 = sshll.u32 %s2235_s7, 4  ;;  %s1420_s18 = int_to_ptr.hbm [resolvable:$true] %s1419_s18 }
  0x1a   :  { %117 = vst.msk [vmem:[#allocation4] sm:$0xff] %vm114_vm0, %v1839_v0  ;;  %260 = vmatpush.msra.mxu1 %v215_v3  ;;  %324 = vmatpush.msra.mxu2 %v1927_v4  ;;  %v127_v8 = vld [vmem:[#allocation11] sm:$0xff]  ;;  %v208_v11 = vld [vmem:[#allocation8 + $0x8] sm:$0xff]  ;;  %v1942_v12 = vld [vmem:[#allocation16 + $0x18] sm:$0xff]  ;;  %s1417_s15 = sshll.u32 %s1843_s12, 4  ;;  %s1844_s1 = smov [#allocation18]   ;;  %s1418_s15 = int_to_ptr.vmem [resolvable:$true] %s1417_s15 }
  0x1b   :  { %118 = vst.msk [vmem:[#allocation5] sm:$0xff] %vm114_vm0, %v1839_v0  ;;  %1466 = vmatmul.msk.f32.vlgmr.msra.gmra.mxu1 %vm133_vm1, %v207_v5  ;;  %172 = vmatpush.msra.mxu0 %v128_v7  ;;  %v1944_v13 = vld [vmem:[#allocation16 + $0x10] sm:$0xff]  ;;  %v1954_v15 = vld [vmem:[#allocation16 + $0x8] sm:$0xff]  ;;  %v1956_v16 = vld [vmem:[#allocation16] sm:$0xff]  ;;  %s1434_s3 = sshll.u32 %s1844_s1, 4  ;;  %s1436_s7 = sshll.u32 %s2236_s8, 4  ;;  %s1435_s3 = int_to_ptr.vmem [resolvable:$true] %s1434_s3  ;;  %s1437_s7 = int_to_ptr.hbm [resolvable:$true] %s1436_s7 }
  0x1c   :  { %325 = vmatpush.msra.mxu2 %v1929_v6  ;;  %395 = vmatpush.msra.mxu3 %v1942_v12  ;;  %v209_v14 = vld [vmem:[#allocation8 + $0x10] sm:$0xff]  ;;  %v210_v18 = vld [vmem:[#allocation8 + $0x18] sm:$0xff]  ;;  %v211_v20 = vld [vmem:[#allocation8 + $0x20] sm:$0xff] }
  0x1d   :  { %173 = vmatpush.msra.mxu0 %v127_v8  ;;  %v212_v22 = vld [vmem:[#allocation8 + $0x28] sm:$0xff]  ;;  %v213_v23 = vld [vmem:[#allocation8 + $0x30] sm:$0xff]  ;;  %v214_v24 = vld [vmem:[#allocation8 + $0x38] sm:$0xff] }
  0x1e   :  { %326 = vmatpush.msra.mxu2 %v1933_v9  ;;  %1458 = vmatmul.msk.f32.vlgmr.msra.gmra.mxu0 %vm133_vm1, %v207_v5  ;;  %v1519_v25 = vld [vmem:[%s2234_s6] ss:$0 sm:$0xff]  ;;  %s1841_s6 = smov 64  }
  0x1f   :  { %v302_v10 = vld [vmem:[#allocation2] sm:$0xff]  ;;  %396 = vmatpush.msra.mxu3 %v1944_v13 }
  0x20   :  { %1474 = vmatmul.msk.f32.vlgmr.msra.gmra.mxu2 %vm114_vm0, %v302_v10  ;;  %v303_v19 = vld [vmem:[#allocation3] sm:$0xff]  ;;  %v1990_v28 = vld [vmem:[%s2233_s5] ss:$0 sm:$0xff] }
  0x21   :  { %467 = vmatpush.msrb.mxu2 %v1924_v2  ;;  %397 = vmatpush.msra.mxu3 %v1954_v15  ;;  %v304_v17 = vld [vmem:[#allocation4] sm:$0xff] }
  0x22   :  { %353 = vrot.lane.b32.xlu1 %v303_v19, %s1840_s4  ;;  %v305_v21 = vld [vmem:[#allocation5] sm:$0xff] }
  0x23   :  { %468 = vmatpush.msrb.mxu2 %v1927_v4  ;;  %1467 = vmatmul.msk.f32.gmra.mxu1 %vm133_vm1, %v208_v11 }
  0x24   :  { %398 = vmatpush.msra.mxu3 %v1956_v16 }
  0x25   :  { %469 = vmatpush.msrb.mxu2 %v1929_v6  ;;  %1476 = vmatmul.msk.f32.vlgmr.msra.gmra.mxu3 %vm114_vm0, %v304_v17 }
  0x26   :  { %1459 = vmatmul.msk.f32.gmra.mxu0 %vm133_vm1, %v208_v11  ;;  %535 = vmatpush.msrb.mxu3 %v1942_v12 }
  0x27   :  { %470 = vmatpush.msrb.mxu2 %v1933_v9 }
  0x28   :  { %536 = vmatpush.msrb.mxu3 %v1944_v13 }
  0x29   :  { %603 = vmatpush.msra.mxu2 %v1924_v2 }
  0x2a   :  { %537 = vmatpush.msrb.mxu3 %v1954_v15  ;;  %425 = vrot.lane.b32.xlu1 %v305_v21, %s1840_s4 }
  0x2b   :  { %604 = vmatpush.msra.mxu2 %v1927_v4  ;;  %1468 = vmatmul.msk.f32.gmra.mxu1 %vm133_vm1, %v209_v14 }
  0x2c   :  { %538 = vmatpush.msrb.mxu3 %v1956_v16 }
  0x2d   :  { %605 = vmatpush.msra.mxu2 %v1929_v6 }
  0x2e   :  { %1460 = vmatmul.msk.f32.gmra.mxu0 %vm133_vm1, %v209_v14  ;;  %671 = vmatpush.msra.mxu3 %v1942_v12 }
  0x2f   :  { %606 = vmatpush.msra.mxu2 %v1933_v9 }
  0x30   :  { %672 = vmatpush.msra.mxu3 %v1944_v13 }
  0x32   :  { %673 = vmatpush.msra.mxu3 %v1954_v15 }
  0x33   :  { %1469 = vmatmul.msk.f32.gmra.mxu1 %vm133_vm1, %v210_v18 }
  0x34   :  { %674 = vmatpush.msra.mxu3 %v1956_v16 }
  0x36   :  { %1461 = vmatmul.msk.f32.gmra.mxu0 %vm133_vm1, %v210_v18 }
  0x3b   :  { %1470 = vmatmul.msk.f32.gmra.mxu1 %vm133_vm1, %v211_v20 }
  0x3e   :  { %1462 = vmatmul.msk.f32.gmra.mxu0 %vm133_vm1, %v211_v20 }
  0x43   :  { %1471 = vmatmul.msk.f32.gmra.mxu1 %vm133_vm1, %v212_v22 }
  0x46   :  { %1463 = vmatmul.msk.f32.gmra.mxu0 %vm133_vm1, %v212_v22 }
  0x4b   :  { %1472 = vmatmul.msk.f32.gmra.mxu1 %vm133_vm1, %v213_v23 }
  0x53   :  { %1473 = vmatmul.msk.f32.gmra.mxu1 %vm133_vm1, %v214_v24 }
  0x98   :  { %v262_v26 = vpop.f32.mrf.mxu1 }
  0x99   :  { %v1985_v27 = vadd.f32 %v1519_v25, %v262_v26 }
  0x9b   :  { %v175_v29 = vpop.f32.mrf.mxu0 }
  0x9c   :  { %v176_v30 = vadd.f32 %v1990_v28, %v175_v29 }
  0xa0   :  { %v265_v31 = vpop.f32.mrf.mxu1 }
  0xa1   :  { %v1993_v32 = vadd.f32 %v1519_v25, %v265_v31 }
  0xa3   :  { %v328_v33 = vpop.f32.mrf.mxu2 }
  0xa4   :  { %v331_v34 = vadd.f32 %v328_v33, %v176_v30 }
  0xa6   :  { %1521 = vtanh.f32 %v331_v34  ;;  %v1475_v51 = vmul.f32 -1.442695, %v331_v34 }
  0xa8   :  { %v268_v35 = vpop.f32.mrf.mxu1  ;;  %v400_v47 = vpop.f32.mrf.mxu3 }
  0xa9   :  { %v1995_v36 = vadd.f32 %v1519_v25, %v268_v35 }
  0xac   :  { %v1522_v37 = vpop.eup %1521 }
  0xad   :  { %358 = vrot.lane.b32.xlu0 %v1522_v37, %s1841_s6 }
  0xb0   :  { %v271_v38 = vpop.f32.mrf.mxu1 }
  0xb1   :  { %v1998_v39 = vadd.f32 %v1519_v25, %v271_v38 }
  0xb8   :  { %v274_v40 = vpop.f32.mrf.mxu1 }
  0xb9   :  { %v2000_v41 = vadd.f32 %v1519_v25, %v274_v40 }
  0xc0   :  { %v277_v42 = vpop.f32.mrf.mxu1 }
  0xc1   :  { %v2002_v43 = vadd.f32 %v1519_v25, %v277_v42 }
  0xc8   :  { %v280_v44 = vpop.f32.mrf.mxu1 }
  0xc9   :  { %v2004_v45 = vadd.f32 %v1519_v25, %v280_v44 }
  0xd0   :  { %v283_v46 = vpop.f32.mrf.mxu1 }
  0xd1   :  { %v284_v48 = vadd.f32 %v1519_v25, %v283_v46  ;;  %v354_v25 = vpop.permute.xlu1 %353 }
  0xd3   :  { %v403_v49 = vadd.f32 %v400_v47, %v284_v48 }
  0xd5   :  { %1523 = vtanh.f32 %v403_v49  ;;  %v1477_v3 = vmul.f32 -1.442695, %v403_v49  ;;  %v178_v49 = vpop.f32.mrf.mxu0 }
  0xd6   :  { %1525 = vpow2.f32 %v1475_v51 }
  0xd9   :  { %v426_v33 = vpop.permute.xlu1 %425 }
  0xdb   :  { %v1524_v50 = vpop.eup %1523 }
  0xdc   :  { %430 = vrot.lane.b32.xlu0 %v1524_v50, %s1841_s6  ;;  %v1526_v52 = vpop.eup %1525  ;;  %v179_v50 = vadd.f32 %v1990_v28, %v178_v49 }
  0xdd   :  { %v335_v53 = vadd.f32 1.0, %v1526_v52 }
  0xdf   :  { %1527 = vrcp.f32 %v335_v53  ;;  %vm341_vm2 = vweird.f32 %v335_v53  ;;  %v347_v58 = vand.u32 2147483648, %v335_v53  ;;  %v345_v60 = vand.u32 2147483647, %v335_v53 }
  0xe0   :  { %1529 = vpow2.f32 %v1477_v3 }
  0xe1   :  { %v348_v61 = vor.u32 1.1754944e-38, %v347_v58  ;;  %vm346_vm5 = vcmp.eq.f32.partialorder %v345_v60, 8.507059e+37 }
  0xe5   :  { %v1528_v54 = vpop.eup %1527 }
  0xe6   :  { %v337_v55 = vmul.f32 %v1528_v54, %v335_v53  ;;  %vm342_vm3 = vweird.f32 %v1528_v54  ;;  %v1530_v5 = vpop.eup %1529 }
  0xe7   :  { %vm343_vm4 = vmor %vm341_vm2, %vm342_vm3  ;;  %v407_v7 = vadd.f32 1.0, %v1530_v5 }
  0xe8   :  { %v338_v56 = vsub.f32 1.0, %v337_v55 }
  0xe9   :  { %1531 = vrcp.f32 %v407_v7  ;;  %v419_v18 = vand.u32 2147483648, %v407_v7  ;;  %vm413_vm7 = vweird.f32 %v407_v7  ;;  %v417_v19 = vand.u32 2147483647, %v407_v7 }
  0xea   :  { %v339_v57 = vmul.f32 %v1528_v54, %v338_v56 }
  0xeb   :  { %v420_v21 = vor.u32 1.1754944e-38, %v419_v18  ;;  %vm418_vm9 = vcmp.eq.f32.partialorder %v417_v19, 8.507059e+37 }
  0xec   :  { %v340_v59 = vadd.f32 %v1528_v54, %v339_v57 }
  0xee   :  { %v344_v62 = vsel %vm343_vm4, %v1528_v54, %v340_v59 }
  0xef   :  { %v349_v63 = vsel %vm346_vm5, %v348_v61, %v344_v62  ;;  %v1532_v8 = vpop.eup %1531 }
  0xf0   :  { %v409_v10 = vmul.f32 %v1532_v8, %v407_v7  ;;  %vm414_vm6 = vweird.f32 %v1532_v8  ;;  %v356_v26 = vmul.f32 %v354_v25, %v349_v63 }
  0xf1   :  { %vm415_vm8 = vmor %vm413_vm7, %vm414_vm6 }
  0xf2   :  { %v410_v11 = vsub.f32 1.0, %v409_v10 }
  0xf4   :  { %v411_v14 = vmul.f32 %v1532_v8, %v410_v11 }
  0xf6   :  { %v412_v17 = vadd.f32 %v1532_v8, %v411_v14 }
  0xf8   :  { %v416_v20 = vsel %vm415_vm8, %v1532_v8, %v412_v17 }
  0xf9   :  { %v421_v22 = vsel %vm418_vm9, %v420_v21, %v416_v20 }
  0xfa   :  { %v428_v34 = vmul.f32 %v426_v33, %v421_v22 }
 0x11f   :  { %v359_v0 = vpop.permute.xlu0 %358 }
 0x120   :  { %v361_v1 = vmul.f32 %v359_v0, %v349_v63 }
 0x122   :  { %363 = vrot.lane.b32.xlu2 %v361_v1, %s1840_s4 }
 0x14e   :  { %v431_v23 = vpop.permute.xlu0 %430 }
 0x14f   :  { %v433_v24 = vmul.f32 %v431_v23, %v421_v22 }
 0x151   :  { %435 = vrot.lane.b32.xlu2 %v433_v24, %s1840_s4 }
 0x17c   :  { %v364_v29 = vpop.permute.xlu2 %363 }
 0x17d   :  { %v2009_v30 = vadd.f32 %v364_v29, %v356_v26 }
 0x17f   :  { %1533 = vtanh.f32 %v2009_v30 }
 0x185   :  { %v1534_v31 = vpop.eup %1533 }
 0x186   :  { %369 = vrot.lane.b32.xlu0 %v1534_v31, %s1841_s6 }
 0x1ab   :  { %v436_v35 = vpop.permute.xlu2 %435 }
 0x1ac   :  { %v2013_v37 = vadd.f32 %v436_v35, %v428_v34 }
 0x1ae   :  { %1535 = vtanh.f32 %v2013_v37 }
 0x1b4   :  { %v1536_v38 = vpop.eup %1535 }
 0x1b5   :  { %441 = vrot.lane.b32.xlu1 %v1536_v38, %s1841_s6 }
 0x1f8   :  { %v370_v40 = vpop.permute.xlu0 %369 }
 0x1f9   :  { %v372_v42 = vmul.f32 %v370_v40, %v349_v63 }
 0x1fb   :  { %374 = vrot.lane.b32.xlu2 %v372_v42, %s1840_s4 }
 0x227   :  { %v442_v44 = vpop.permute.xlu1 %441 }
 0x228   :  { %v444_v46 = vmul.f32 %v442_v44, %v421_v22 }
 0x22a   :  { %446 = vrot.lane.b32.xlu0 %v444_v46, %s1840_s4 }
 0x255   :  { %v375_v47 = vpop.permute.xlu2 %374 }
 0x256   :  { %377 = vst.msk [vmem:[#allocation17] sm:$0xff] %vm114_vm0, %v375_v47  ;;  %1478 = vmatmul.msk.f32.vlgmr.msrb.gmra.mxu2 %vm114_vm0, %v375_v47 }
 0x257   :  { %739 = vmatpush.msrb.mxu2 %v1924_v2 }
 0x259   :  { %740 = vmatpush.msrb.mxu2 %v1927_v4 }
 0x25b   :  { %741 = vmatpush.msrb.mxu2 %v1929_v6 }
 0x25d   :  { %742 = vmatpush.msrb.mxu2 %v1933_v9 }
 0x29c   :  { %v447_v48 = vpop.permute.xlu0 %446 }
 0x29d   :  { %450 = vst.msk [vmem:[#allocation18 + $0x38] sm:$0xff] %vm114_vm0, %v447_v48  ;;  %1480 = vmatmul.msk.f32.vlgmr.msrb.gmra.mxu3 %vm114_vm0, %v447_v48 }
 0x29e   :  { %807 = vmatpush.msrb.mxu3 %v1942_v12 }
 0x2a0   :  { %808 = vmatpush.msrb.mxu3 %v1944_v13 }
 0x2a2   :  { %809 = vmatpush.msrb.mxu3 %v1954_v15 }
 0x2a4   :  { %810 = vmatpush.msrb.mxu3 %v1956_v16 }
 0x2d9   :  { %v472_v51 = vpop.f32.mrf.mxu2 }
 0x2da   :  { %v475_v52 = vadd.f32 %v472_v51, %v179_v50 }
 0x2dc   :  { %1537 = vtanh.f32 %v475_v52  ;;  %v1479_v56 = vmul.f32 -1.442695, %v475_v52  ;;  %v181_v52 = vpop.f32.mrf.mxu0 }
 0x2e2   :  { %v1538_v53 = vpop.eup %1537 }
 0x2e3   :  { %498 = vrot.lane.b32.xlu1 %v1538_v53, %s1841_s6  ;;  %v182_v53 = vadd.f32 %v1990_v28, %v181_v52 }
 0x320   :  { %v540_v54 = vpop.f32.mrf.mxu3 }
 0x321   :  { %v543_v55 = vadd.f32 %v540_v54, %v2004_v45 }
 0x323   :  { %1539 = vtanh.f32 %v543_v55  ;;  %v1481_v11 = vmul.f32 -1.442695, %v543_v55 }
 0x324   :  { %1541 = vpow2.f32 %v1479_v56 }
 0x329   :  { %v1540_v57 = vpop.eup %1539 }
 0x32a   :  { %566 = vrot.lane.b32.xlu2 %v1540_v57, %s1841_s6  ;;  %v1542_v58 = vpop.eup %1541 }
 0x32b   :  { %v479_v59 = vadd.f32 1.0, %v1542_v58 }
 0x32d   :  { %1543 = vrcp.f32 %v479_v59  ;;  %v491_v1 = vand.u32 2147483648, %v479_v59  ;;  %vm485_vm11 = vweird.f32 %v479_v59  ;;  %v489_v3 = vand.u32 2147483647, %v479_v59 }
 0x32e   :  { %1545 = vpow2.f32 %v1481_v11 }
 0x32f   :  { %v492_v5 = vor.u32 1.1754944e-38, %v491_v1  ;;  %vm490_vm13 = vcmp.eq.f32.partialorder %v489_v3, 8.507059e+37 }
 0x333   :  { %v1544_v60 = vpop.eup %1543 }
 0x334   :  { %v481_v61 = vmul.f32 %v1544_v60, %v479_v59  ;;  %vm486_vm10 = vweird.f32 %v1544_v60  ;;  %v1546_v14 = vpop.eup %1545 }
 0x335   :  { %vm487_vm12 = vmor %vm485_vm11, %vm486_vm10  ;;  %v547_v17 = vadd.f32 1.0, %v1546_v14 }
 0x336   :  { %v482_v62 = vsub.f32 1.0, %v481_v61 }
 0x337   :  { %1547 = vrcp.f32 %v547_v17  ;;  %v559_v23 = vand.u32 2147483648, %v547_v17  ;;  %vm553_vm15 = vweird.f32 %v547_v17  ;;  %v557_v24 = vand.u32 2147483647, %v547_v17 }
 0x338   :  { %v483_v63 = vmul.f32 %v1544_v60, %v482_v62 }
 0x339   :  { %v560_v26 = vor.u32 1.1754944e-38, %v559_v23  ;;  %vm558_vm3 = vcmp.eq.f32.partialorder %v557_v24, 8.507059e+37 }
 0x33a   :  { %v484_v0 = vadd.f32 %v1544_v60, %v483_v63 }
 0x33c   :  { %v488_v45 = vsel %vm487_vm12, %v1544_v60, %v484_v0 }
 0x33d   :  { %v493_v8 = vsel %vm490_vm13, %v492_v5, %v488_v45  ;;  %v1548_v18 = vpop.eup %1547 }
 0x33e   :  { %v549_v19 = vmul.f32 %v1548_v18, %v547_v17  ;;  %vm554_vm14 = vweird.f32 %v1548_v18  ;;  %v496_v34 = vmul.f32 %v493_v8, %v2009_v30 }
 0x33f   :  { %vm555_vm2 = vmor %vm553_vm15, %vm554_vm14 }
 0x340   :  { %v550_v20 = vsub.f32 1.0, %v549_v19 }
 0x342   :  { %v551_v21 = vmul.f32 %v1548_v18, %v550_v20 }
 0x344   :  { %v552_v22 = vadd.f32 %v1548_v18, %v551_v21 }
 0x346   :  { %v556_v25 = vsel %vm555_vm2, %v1548_v18, %v552_v22 }
 0x347   :  { %v561_v31 = vsel %vm558_vm3, %v560_v26, %v556_v25 }
 0x348   :  { %v564_v42 = vmul.f32 %v561_v31, %v2013_v37 }
 0x355   :  { %v499_v7 = vpop.permute.xlu1 %498 }
 0x356   :  { %v501_v10 = vmul.f32 %v499_v7, %v493_v8 }
 0x358   :  { %503 = vrot.lane.b32.xlu0 %v501_v10, %s1840_s4 }
 0x384   :  { %v567_v29 = vpop.permute.xlu2 %566 }
 0x385   :  { %v569_v33 = vmul.f32 %v567_v29, %v561_v31 }
 0x387   :  { %571 = vrot.lane.b32.xlu1 %v569_v33, %s1840_s4 }
 0x3ca   :  { %v504_v35 = vpop.permute.xlu0 %503 }
 0x3cb   :  { %v2038_v38 = vadd.f32 %v504_v35, %v496_v34 }
 0x3cd   :  { %1549 = vtanh.f32 %v2038_v38 }
 0x3d3   :  { %v1550_v40 = vpop.eup %1549 }
 0x3d4   :  { %509 = vrot.lane.b32.xlu2 %v1550_v40, %s1841_s6 }
 0x3f9   :  { %v572_v44 = vpop.permute.xlu1 %571 }
 0x3fa   :  { %v2043_v46 = vadd.f32 %v572_v44, %v564_v42 }
 0x3fc   :  { %1551 = vtanh.f32 %v2043_v46 }
 0x402   :  { %v1552_v47 = vpop.eup %1551 }
 0x403   :  { %577 = vrot.lane.b32.xlu0 %v1552_v47, %s1841_s6 }
 0x42e   :  { %v510_v48 = vpop.permute.xlu2 %509 }
 0x42f   :  { %v512_v30 = vmul.f32 %v510_v48, %v493_v8 }
 0x431   :  { %514 = vrot.lane.b32.xlu1 %v512_v30, %s1840_s4 }
 0x475   :  { %v578_v49 = vpop.permute.xlu0 %577 }
 0x476   :  { %v580_v50 = vmul.f32 %v578_v49, %v561_v31 }
 0x478   :  { %582 = vrot.lane.b32.xlu2 %v580_v50, %s1840_s4 }
 0x4a3   :  { %v515_v51 = vpop.permute.xlu1 %514 }
 0x4a4   :  { %518 = vst.msk [vmem:[#allocation17 + $0x8] sm:$0xff] %vm114_vm0, %v515_v51  ;;  %1482 = vmatmul.msk.f32.vlgmr.msra.gmra.mxu2 %vm114_vm0, %v515_v51 }
 0x4a5   :  { %875 = vmatpush.msra.mxu2 %v1924_v2 }
 0x4a7   :  { %876 = vmatpush.msra.mxu2 %v1927_v4 }
 0x4a9   :  { %877 = vmatpush.msra.mxu2 %v1929_v6 }
 0x4ab   :  { %878 = vmatpush.msra.mxu2 %v1933_v9 }
 0x4d2   :  { %v583_v37 = vpop.permute.xlu2 %582 }
 0x4d3   :  { %586 = vst.msk [vmem:[#allocation18 + $0x30] sm:$0xff] %vm114_vm0, %v583_v37  ;;  %1484 = vmatmul.msk.f32.vlgmr.msra.gmra.mxu3 %vm114_vm0, %v583_v37 }
 0x4d4   :  { %943 = vmatpush.msra.mxu3 %v1942_v12 }
 0x4d6   :  { %944 = vmatpush.msra.mxu3 %v1944_v13 }
 0x4d8   :  { %945 = vmatpush.msra.mxu3 %v1954_v15 }
 0x4da   :  { %946 = vmatpush.msra.mxu3 %v1956_v16 }
 0x527   :  { %v608_v54 = vpop.f32.mrf.mxu2 }
 0x528   :  { %v611_v55 = vadd.f32 %v608_v54, %v182_v53  ;;  %v184_v54 = vpop.f32.mrf.mxu0 }
 0x52a   :  { %1553 = vtanh.f32 %v611_v55  ;;  %v1483_v60 = vmul.f32 -1.442695, %v611_v55  ;;  %v185_v55 = vadd.f32 %v1990_v28, %v184_v54 }
 0x530   :  { %v1554_v56 = vpop.eup %1553 }
 0x531   :  { %634 = vrot.lane.b32.xlu0 %v1554_v56, %s1841_s6 }
 0x556   :  { %v676_v57 = vpop.f32.mrf.mxu3 }
 0x557   :  { %v679_v58 = vadd.f32 %v676_v57, %v2002_v43 }
 0x559   :  { %1555 = vtanh.f32 %v679_v58  ;;  %v1485_v17 = vmul.f32 -1.442695, %v679_v58 }
 0x55a   :  { %1557 = vpow2.f32 %v1483_v60 }
 0x55f   :  { %v1556_v59 = vpop.eup %1555 }
 0x560   :  { %702 = vrot.lane.b32.xlu1 %v1556_v59, %s1841_s6  ;;  %v1558_v61 = vpop.eup %1557 }
 0x561   :  { %v615_v62 = vadd.f32 1.0, %v1558_v61 }
 0x563   :  { %1559 = vrcp.f32 %v615_v62  ;;  %v627_v5 = vand.u32 2147483648, %v615_v62  ;;  %vm621_vm5 = vweird.f32 %v615_v62  ;;  %v625_v7 = vand.u32 2147483647, %v615_v62 }
 0x564   :  { %1561 = vpow2.f32 %v1485_v17 }
 0x565   :  { %v628_v8 = vor.u32 1.1754944e-38, %v627_v5  ;;  %vm626_vm7 = vcmp.eq.f32.partialorder %v625_v7, 8.507059e+37 }
 0x569   :  { %v1560_v63 = vpop.eup %1559 }
 0x56a   :  { %v617_v0 = vmul.f32 %v1560_v63, %v615_v62  ;;  %vm622_vm4 = vweird.f32 %v1560_v63  ;;  %v1562_v18 = vpop.eup %1561 }
 0x56b   :  { %vm623_vm6 = vmor %vm621_vm5, %vm622_vm4  ;;  %v683_v19 = vadd.f32 1.0, %v1562_v18 }
 0x56c   :  { %v618_v1 = vsub.f32 1.0, %v617_v0 }
 0x56d   :  { %1563 = vrcp.f32 %v683_v19  ;;  %v695_v25 = vand.u32 2147483648, %v683_v19  ;;  %vm689_vm9 = vweird.f32 %v683_v19  ;;  %v693_v26 = vand.u32 2147483647, %v683_v19 }
 0x56e   :  { %v619_v3 = vmul.f32 %v1560_v63, %v618_v1 }
 0x56f   :  { %v696_v31 = vor.u32 1.1754944e-38, %v695_v25  ;;  %vm694_vm11 = vcmp.eq.f32.partialorder %v693_v26, 8.507059e+37 }
 0x570   :  { %v620_v45 = vadd.f32 %v1560_v63, %v619_v3 }
 0x572   :  { %v624_v43 = vsel %vm623_vm6, %v1560_v63, %v620_v45 }
 0x573   :  { %v629_v10 = vsel %vm626_vm7, %v628_v8, %v624_v43  ;;  %v1564_v20 = vpop.eup %1563 }
 0x574   :  { %v685_v21 = vmul.f32 %v1564_v20, %v683_v19  ;;  %vm690_vm8 = vweird.f32 %v1564_v20  ;;  %v632_v40 = vmul.f32 %v629_v10, %v2038_v38 }
 0x575   :  { %vm691_vm10 = vmor %vm689_vm9, %vm690_vm8 }
 0x576   :  { %v686_v22 = vsub.f32 1.0, %v685_v21 }
 0x578   :  { %v687_v23 = vmul.f32 %v1564_v20, %v686_v22 }
 0x57a   :  { %v688_v24 = vadd.f32 %v1564_v20, %v687_v23 }
 0x57c   :  { %v692_v29 = vsel %vm691_vm10, %v1564_v20, %v688_v24 }
 0x57d   :  { %v697_v34 = vsel %vm694_vm11, %v696_v31, %v692_v29 }
 0x57e   :  { %v700_v48 = vmul.f32 %v697_v34, %v2043_v46 }
 0x5a3   :  { %v635_v11 = vpop.permute.xlu0 %634 }
 0x5a4   :  { %v637_v14 = vmul.f32 %v635_v11, %v629_v10 }
 0x5a6   :  { %639 = vrot.lane.b32.xlu2 %v637_v14, %s1840_s4 }
 0x5d2   :  { %v703_v33 = vpop.permute.xlu1 %702 }
 0x5d3   :  { %v705_v35 = vmul.f32 %v703_v33, %v697_v34 }
 0x5d5   :  { %707 = vrot.lane.b32.xlu0 %v705_v35, %s1840_s4 }
 0x600   :  { %v640_v42 = vpop.permute.xlu2 %639 }
 0x601   :  { %v2068_v44 = vadd.f32 %v640_v42, %v632_v40 }
 0x603   :  { %1565 = vtanh.f32 %v2068_v44 }
 0x609   :  { %v1566_v47 = vpop.eup %1565 }
 0x60a   :  { %645 = vrot.lane.b32.xlu1 %v1566_v47, %s1841_s6 }
 0x647   :  { %v708_v30 = vpop.permute.xlu0 %707 }
 0x648   :  { %v2073_v49 = vadd.f32 %v708_v30, %v700_v48 }
 0x64a   :  { %1567 = vtanh.f32 %v2073_v49 }
 0x650   :  { %v1568_v50 = vpop.eup %1567 }
 0x651   :  { %713 = vrot.lane.b32.xlu2 %v1568_v50, %s1841_s6 }
 0x67c   :  { %v646_v51 = vpop.permute.xlu1 %645 }
 0x67d   :  { %v648_v38 = vmul.f32 %v646_v51, %v629_v10 }
 0x67f   :  { %650 = vrot.lane.b32.xlu0 %v648_v38, %s1840_s4 }
 0x6ab   :  { %v714_v37 = vpop.permute.xlu2 %713 }
 0x6ac   :  { %v716_v52 = vmul.f32 %v714_v37, %v697_v34 }
 0x6ae   :  { %718 = vrot.lane.b32.xlu1 %v716_v52, %s1840_s4 }
 0x6f1   :  { %v651_v53 = vpop.permute.xlu0 %650 }
 0x6f2   :  { %654 = vst.msk [vmem:[#allocation17 + $0x10] sm:$0xff] %vm114_vm0, %v651_v53  ;;  %1486 = vmatmul.msk.f32.vlgmr.msrb.gmra.mxu2 %vm114_vm0, %v651_v53 }
 0x6f3   :  { %1011 = vmatpush.msrb.mxu2 %v1924_v2 }
 0x6f5   :  { %1012 = vmatpush.msrb.mxu2 %v1927_v4 }
 0x6f7   :  { %1013 = vmatpush.msrb.mxu2 %v1929_v6 }
 0x6f9   :  { %1014 = vmatpush.msrb.mxu2 %v1933_v9 }
 0x720   :  { %v719_v46 = vpop.permute.xlu1 %718 }
 0x721   :  { %722 = vst.msk [vmem:[#allocation18 + $0x28] sm:$0xff] %vm114_vm0, %v719_v46  ;;  %1488 = vmatmul.msk.f32.vlgmr.msrb.gmra.mxu3 %vm114_vm0, %v719_v46 }
 0x722   :  { %1079 = vmatpush.msrb.mxu3 %v1942_v12 }
 0x724   :  { %1080 = vmatpush.msrb.mxu3 %v1944_v13 }
 0x726   :  { %1081 = vmatpush.msrb.mxu3 %v1954_v15 }
 0x728   :  { %1082 = vmatpush.msrb.mxu3 %v1956_v16 }
 0x775   :  { %v744_v56 = vpop.f32.mrf.mxu2 }
 0x776   :  { %v747_v57 = vadd.f32 %v744_v56, %v185_v55 }
 0x778   :  { %1569 = vtanh.f32 %v747_v57  ;;  %v1487_v61 = vmul.f32 -1.442695, %v747_v57 }
 0x77e   :  { %v1570_v58 = vpop.eup %1569 }
 0x77f   :  { %770 = vrot.lane.b32.xlu2 %v1570_v58, %s1841_s6 }
 0x7a4   :  { %v812_v59 = vpop.f32.mrf.mxu3 }
 0x7a5   :  { %v815_v60 = vadd.f32 %v812_v59, %v2000_v41 }
 0x7a7   :  { %1571 = vtanh.f32 %v815_v60  ;;  %v1489_v18 = vmul.f32 -1.442695, %v815_v60 }
 0x7a8   :  { %1573 = vpow2.f32 %v1487_v61 }
 0x7ad   :  { %v1572_v62 = vpop.eup %1571 }
 0x7ae   :  { %838 = vrot.lane.b32.xlu0 %v1572_v62, %s1841_s6  ;;  %v1574_v63 = vpop.eup %1573 }
 0x7af   :  { %v751_v0 = vadd.f32 1.0, %v1574_v63 }
 0x7b1   :  { %1575 = vrcp.f32 %v751_v0  ;;  %v763_v43 = vand.u32 2147483648, %v751_v0  ;;  %vm757_vm13 = vweird.f32 %v751_v0  ;;  %v761_v8 = vand.u32 2147483647, %v751_v0 }
 0x7b2   :  { %1577 = vpow2.f32 %v1489_v18 }
 0x7b3   :  { %v764_v10 = vor.u32 1.1754944e-38, %v763_v43  ;;  %vm762_vm15 = vcmp.eq.f32.partialorder %v761_v8, 8.507059e+37 }
 0x7b7   :  { %v1576_v1 = vpop.eup %1575 }
 0x7b8   :  { %v753_v3 = vmul.f32 %v1576_v1, %v751_v0  ;;  %vm758_vm12 = vweird.f32 %v1576_v1  ;;  %v1578_v19 = vpop.eup %1577 }
 0x7b9   :  { %vm759_vm14 = vmor %vm757_vm13, %vm758_vm12  ;;  %v819_v20 = vadd.f32 1.0, %v1578_v19 }
 0x7ba   :  { %v754_v45 = vsub.f32 1.0, %v753_v3 }
 0x7bb   :  { %1579 = vrcp.f32 %v819_v20  ;;  %v831_v26 = vand.u32 2147483648, %v819_v20  ;;  %vm825_vm3 = vweird.f32 %v819_v20  ;;  %v829_v29 = vand.u32 2147483647, %v819_v20 }
 0x7bc   :  { %v755_v5 = vmul.f32 %v1576_v1, %v754_v45 }
 0x7bd   :  { %v832_v33 = vor.u32 1.1754944e-38, %v831_v26  ;;  %vm830_vm5 = vcmp.eq.f32.partialorder %v829_v29, 8.507059e+37 }
 0x7be   :  { %v756_v7 = vadd.f32 %v1576_v1, %v755_v5 }
 0x7c0   :  { %v760_v41 = vsel %vm759_vm14, %v1576_v1, %v756_v7 }
 0x7c1   :  { %v765_v14 = vsel %vm762_vm15, %v764_v10, %v760_v41  ;;  %v1580_v21 = vpop.eup %1579 }
 0x7c2   :  { %v821_v22 = vmul.f32 %v1580_v21, %v819_v20  ;;  %vm826_vm2 = vweird.f32 %v1580_v21  ;;  %v768_v42 = vmul.f32 %v765_v14, %v2068_v44 }
 0x7c3   :  { %vm827_vm4 = vmor %vm825_vm3, %vm826_vm2 }
 0x7c4   :  { %v822_v23 = vsub.f32 1.0, %v821_v22 }
 0x7c6   :  { %v823_v24 = vmul.f32 %v1580_v21, %v822_v23 }
 0x7c8   :  { %v824_v25 = vadd.f32 %v1580_v21, %v823_v24 }
 0x7ca   :  { %v828_v31 = vsel %vm827_vm4, %v1580_v21, %v824_v25 }
 0x7cb   :  { %v833_v34 = vsel %vm830_vm5, %v832_v33, %v828_v31 }
 0x7cc   :  { %v836_v50 = vmul.f32 %v833_v34, %v2073_v49 }
 0x7d9   :  { %v771_v11 = vpop.permute.xlu2 %770 }
 0x7da   :  { %v773_v17 = vmul.f32 %v771_v11, %v765_v14 }
 0x7dc   :  { %775 = vrot.lane.b32.xlu1 %v773_v17, %s1840_s4 }
 0x820   :  { %v839_v35 = vpop.permute.xlu0 %838 }
 0x821   :  { %v841_v40 = vmul.f32 %v839_v35, %v833_v34 }
 0x823   :  { %843 = vrot.lane.b32.xlu2 %v841_v40, %s1840_s4 }
 0x84e   :  { %v776_v47 = vpop.permute.xlu1 %775 }
 0x84f   :  { %v2098_v48 = vadd.f32 %v776_v47, %v768_v42 }
 0x851   :  { %1581 = vtanh.f32 %v2098_v48 }
 0x857   :  { %v1582_v30 = vpop.eup %1581 }
 0x858   :  { %781 = vrot.lane.b32.xlu0 %v1582_v30, %s1841_s6 }
 0x87d   :  { %v844_v51 = vpop.permute.xlu2 %843 }
 0x87e   :  { %v2103_v38 = vadd.f32 %v844_v51, %v836_v50 }
 0x880   :  { %1583 = vtanh.f32 %v2103_v38 }
 0x886   :  { %v1584_v37 = vpop.eup %1583 }
 0x887   :  { %849 = vrot.lane.b32.xlu1 %v1584_v37, %s1841_s6 }
 0x8ca   :  { %v782_v52 = vpop.permute.xlu0 %781 }
 0x8cb   :  { %v784_v44 = vmul.f32 %v782_v52, %v765_v14 }
 0x8cd   :  { %786 = vrot.lane.b32.xlu2 %v784_v44, %s1840_s4 }
 0x8f9   :  { %v850_v53 = vpop.permute.xlu1 %849 }
 0x8fa   :  { %v852_v46 = vmul.f32 %v850_v53, %v833_v34  ;;  %v1650_v53 = vld [vmem:[#allocation13 + $0x10] sm:$0xff] }
 0x8fc   :  { %854 = vrot.lane.b32.xlu0 %v852_v46, %s1840_s4  ;;  %v1651_v46 = vld [vmem:[#allocation13 + $0x8] sm:$0xff] }
 0x927   :  { %v787_v54 = vpop.permute.xlu2 %786 }
 0x928   :  { %790 = vst.msk [vmem:[#allocation17 + $0x18] sm:$0xff] %vm114_vm0, %v787_v54  ;;  %1490 = vmatmul.msk.f32.vlgmr.msra.gmra.mxu2 %vm114_vm0, %v787_v54  ;;  %v1652_v54 = vld [vmem:[#allocation13] sm:$0xff] }
 0x929   :  { %1147 = vmatpush.msra.mxu2 %v1924_v2  ;;  %v187_v2 = vpop.f32.mrf.mxu0 }
 0x92b   :  { %1148 = vmatpush.msra.mxu2 %v1927_v4  ;;  %v188_v4 = vadd.f32 %v1990_v28, %v187_v2 }
 0x92d   :  { %1149 = vmatpush.msra.mxu2 %v1929_v6 }
 0x92f   :  { %1150 = vmatpush.msra.mxu2 %v1933_v9 }
 0x931   :  { %v190_v2 = vpop.f32.mrf.mxu0 }
 0x96e   :  { %v855_v49 = vpop.permute.xlu0 %854 }
 0x96f   :  { %858 = vst.msk [vmem:[#allocation18 + $0x20] sm:$0xff] %vm114_vm0, %v855_v49  ;;  %1492 = vmatmul.msk.f32.vlgmr.msra.gmra.mxu3 %vm114_vm0, %v855_v49 }
 0x970   :  { %1215 = vmatpush.msra.mxu3 %v1942_v12 }
 0x972   :  { %1216 = vmatpush.msra.mxu3 %v1944_v13 }
 0x974   :  { %1217 = vmatpush.msra.mxu3 %v1954_v15 }
 0x976   :  { %1218 = vmatpush.msra.mxu3 %v1956_v16 }
 0x9ab   :  { %v880_v55 = vpop.f32.mrf.mxu2 }
 0x9ac   :  { %v883_v6 = vadd.f32 %v880_v55, %v188_v4  ;;  %v191_v4 = vadd.f32 %v1990_v28, %v190_v2 }
 0x9ae   :  { %1585 = vtanh.f32 %v883_v6  ;;  %v1491_v58 = vmul.f32 -1.442695, %v883_v6 }
 0x9b4   :  { %v1586_v9 = vpop.eup %1585 }
 0x9b5   :  { %906 = vrot.lane.b32.xlu1 %v1586_v9, %s1841_s6 }
 0x9f2   :  { %v948_v56 = vpop.f32.mrf.mxu3 }
 0x9f3   :  { %v951_v57 = vadd.f32 %v948_v56, %v1998_v39 }
 0x9f5   :  { %1587 = vtanh.f32 %v951_v57  ;;  %v1493_v10 = vmul.f32 -1.442695, %v951_v57 }
 0x9f6   :  { %1589 = vpow2.f32 %v1491_v58 }
 0x9fb   :  { %v1588_v59 = vpop.eup %1587 }
 0x9fc   :  { %974 = vrot.lane.b32.xlu2 %v1588_v59, %s1841_s6  ;;  %v1590_v60 = vpop.eup %1589 }
 0x9fd   :  { %v887_v61 = vadd.f32 1.0, %v1590_v60 }
 0x9ff   :  { %1591 = vrcp.f32 %v887_v61  ;;  %v899_v45 = vand.u32 2147483648, %v887_v61  ;;  %vm893_vm7 = vweird.f32 %v887_v61  ;;  %v897_v5 = vand.u32 2147483647, %v887_v61 }
 0xa00   :  { %1593 = vpow2.f32 %v1493_v10 }
 0xa01   :  { %v900_v7 = vor.u32 1.1754944e-38, %v899_v45  ;;  %vm898_vm9 = vcmp.eq.f32.partialorder %v897_v5, 8.507059e+37 }
 0xa05   :  { %v1592_v62 = vpop.eup %1591 }
 0xa06   :  { %v889_v63 = vmul.f32 %v1592_v62, %v887_v61  ;;  %vm894_vm6 = vweird.f32 %v1592_v62  ;;  %v1594_v11 = vpop.eup %1593 }
 0xa07   :  { %vm895_vm8 = vmor %vm893_vm7, %vm894_vm6  ;;  %v955_v14 = vadd.f32 1.0, %v1594_v11 }
 0xa08   :  { %v890_v0 = vsub.f32 1.0, %v889_v63 }
 0xa09   :  { %1595 = vrcp.f32 %v955_v14  ;;  %v967_v22 = vand.u32 2147483648, %v955_v14  ;;  %vm961_vm11 = vweird.f32 %v955_v14  ;;  %v965_v23 = vand.u32 2147483647, %v955_v14 }
 0xa0a   :  { %v891_v1 = vmul.f32 %v1592_v62, %v890_v0 }
 0xa0b   :  { %v968_v25 = vor.u32 1.1754944e-38, %v967_v22  ;;  %vm966_vm13 = vcmp.eq.f32.partialorder %v965_v23, 8.507059e+37 }
 0xa0c   :  { %v892_v3 = vadd.f32 %v1592_v62, %v891_v1 }
 0xa0e   :  { %v896_v39 = vsel %vm895_vm8, %v1592_v62, %v892_v3 }
 0xa0f   :  { %v901_v8 = vsel %vm898_vm9, %v900_v7, %v896_v39  ;;  %v1596_v17 = vpop.eup %1595 }
 0xa10   :  { %v957_v18 = vmul.f32 %v1596_v17, %v955_v14  ;;  %vm962_vm10 = vweird.f32 %v1596_v17  ;;  %v904_v33 = vmul.f32 %v901_v8, %v2098_v48 }
 0xa11   :  { %vm963_vm12 = vmor %vm961_vm11, %vm962_vm10 }
 0xa12   :  { %v958_v19 = vsub.f32 1.0, %v957_v18 }
 0xa14   :  { %v959_v20 = vmul.f32 %v1596_v17, %v958_v19 }
 0xa16   :  { %v960_v21 = vadd.f32 %v1596_v17, %v959_v20 }
 0xa18   :  { %v964_v24 = vsel %vm963_vm12, %v1596_v17, %v960_v21 }
 0xa19   :  { %v969_v29 = vsel %vm966_vm13, %v968_v25, %v964_v24 }
 0xa1a   :  { %v972_v42 = vmul.f32 %v969_v29, %v2103_v38  ;;  %v1649_v38 = vld [vmem:[#allocation13 + $0x18] sm:$0xff] }
 0xa27   :  { %v907_v43 = vpop.permute.xlu1 %906 }
 0xa28   :  { %v909_v41 = vmul.f32 %v907_v43, %v901_v8 }
 0xa2a   :  { %911 = vrot.lane.b32.xlu0 %v909_v41, %s1840_s4 }
 0xa56   :  { %v975_v26 = vpop.permute.xlu2 %974 }
 0xa57   :  { %v977_v31 = vmul.f32 %v975_v26, %v969_v29 }
 0xa59   :  { %979 = vrot.lane.b32.xlu1 %v977_v31, %s1840_s4 }
 0xa9c   :  { %v912_v34 = vpop.permute.xlu0 %911 }
 0xa9d   :  { %v2128_v35 = vadd.f32 %v912_v34, %v904_v33 }
 0xa9f   :  { %1597 = vtanh.f32 %v2128_v35 }
 0xaa5   :  { %v1598_v40 = vpop.eup %1597 }
 0xaa6   :  { %917 = vrot.lane.b32.xlu2 %v1598_v40, %s1841_s6 }
 0xacb   :  { %v980_v47 = vpop.permute.xlu1 %979 }
 0xacc   :  { %v2133_v30 = vadd.f32 %v980_v47, %v972_v42 }
 0xace   :  { %1599 = vtanh.f32 %v2133_v30 }
 0xad4   :  { %v1600_v50 = vpop.eup %1599 }
 0xad5   :  { %985 = vrot.lane.b32.xlu0 %v1600_v50, %s1841_s6  ;;  %v125_v50 = vld [vmem:[#allocation8 + $0x30] sm:$0xff] }
 0xad6   :  { %1464 = vmatmul.msk.f32.gmra.mxu0 %vm133_vm1, %v125_v50 }
 0xb00   :  { %v918_v51 = vpop.permute.xlu2 %917 }
 0xb01   :  { %v920_v48 = vmul.f32 %v918_v51, %v901_v8 }
 0xb03   :  { %922 = vrot.lane.b32.xlu1 %v920_v48, %s1840_s4 }
 0xb47   :  { %v986_v37 = vpop.permute.xlu0 %985 }
 0xb48   :  { %v988_v52 = vmul.f32 %v986_v37, %v969_v29  ;;  %v2173_v37 = vld [vmem:[%s2233_s5] ss:$0 sm:$0xff]  ;;  %s1842_s5 = smov 96  }
 0xb4a   :  { %990 = vrot.lane.b32.xlu2 %v988_v52, %s1840_s4 }
 0xb53   :  { %v193_v48 = vpop.f32.mrf.mxu0 }
 0xb54   :  { %v194_v52 = vadd.f32 %v2173_v37, %v193_v48 }
 0xb75   :  { %v923_v44 = vpop.permute.xlu1 %922 }
 0xb76   :  { %926 = vst.msk [vmem:[#allocation17 + $0x20] sm:$0xff] %vm114_vm0, %v923_v44  ;;  %1494 = vmatmul.msk.f32.vlgmr.msrb.gmra.mxu2 %vm114_vm0, %v923_v44 }
 0xb77   :  { %1283 = vmatpush.msrb.mxu2 %v1649_v38 }
 0xb79   :  { %1284 = vmatpush.msrb.mxu2 %v1650_v53 }
 0xb7b   :  { %1285 = vmatpush.msrb.mxu2 %v1651_v46 }
 0xb7d   :  { %1286 = vmatpush.msrb.mxu2 %v1652_v54 }
 0xba4   :  { %v991_v49 = vpop.permute.xlu2 %990 }
 0xba5   :  { %994 = vst.msk [vmem:[#allocation18 + $0x18] sm:$0xff] %vm114_vm0, %v991_v49  ;;  %1496 = vmatmul.msk.f32.vlgmr.msrb.gmra.mxu3 %vm114_vm0, %v991_v49 }
 0xba6   :  { %1350 = vmatpush.msrb.mxu3 %v1942_v12 }
 0xba8   :  { %1351 = vmatpush.msrb.mxu3 %v1944_v13 }
 0xbaa   :  { %1352 = vmatpush.msrb.mxu3 %v1954_v15 }
 0xbac   :  { %1353 = vmatpush.msrb.mxu3 %v1956_v16 }
 0xbf9   :  { %v1016_v55 = vpop.f32.mrf.mxu2 }
 0xbfa   :  { %v1019_v6 = vadd.f32 %v1016_v55, %v191_v4 }
 0xbfc   :  { %1601 = vtanh.f32 %v1019_v6  ;;  %v1495_v13 = vmul.f32 -1.442695, %v1019_v6 }
 0xc02   :  { %v1602_v9 = vpop.eup %1601 }
 0xc03   :  { %1042 = vrot.lane.b32.xlu0 %v1602_v9, %s1841_s6 }
 0xc28   :  { %v1084_v56 = vpop.f32.mrf.mxu3 }
 0xc29   :  { %v1087_v57 = vadd.f32 %v1084_v56, %v1995_v36 }
 0xc2b   :  { %1603 = vtanh.f32 %v1087_v57  ;;  %v1497_v5 = vmul.f32 -1.442695, %v1087_v57 }
 0xc2c   :  { %1605 = vpow2.f32 %v1495_v13 }
 0xc31   :  { %v1604_v12 = vpop.eup %1603 }
 0xc32   :  { %1110 = vrot.lane.b32.xlu1 %v1604_v12, %s1841_s6  ;;  %v1606_v15 = vpop.eup %1605 }
 0xc33   :  { %v1023_v16 = vadd.f32 1.0, %v1606_v15 }
 0xc35   :  { %1607 = vrcp.f32 %v1023_v16  ;;  %v1035_v62 = vand.u32 2147483648, %v1023_v16  ;;  %vm1029_vm15 = vweird.f32 %v1023_v16  ;;  %v1033_v63 = vand.u32 2147483647, %v1023_v16 }
 0xc36   :  { %1609 = vpow2.f32 %v1497_v5 }
 0xc37   :  { %v1036_v0 = vor.u32 1.1754944e-38, %v1035_v62  ;;  %vm1034_vm3 = vcmp.eq.f32.partialorder %v1033_v63, 8.507059e+37 }
 0xc3b   :  { %v1608_v58 = vpop.eup %1607 }
 0xc3c   :  { %v1025_v28 = vmul.f32 %v1608_v58, %v1023_v16  ;;  %vm1030_vm14 = vweird.f32 %v1608_v58  ;;  %v1610_v39 = vpop.eup %1609 }
 0xc3d   :  { %vm1031_vm2 = vmor %vm1029_vm15, %vm1030_vm14  ;;  %v1091_v7 = vadd.f32 1.0, %v1610_v39 }
 0xc3e   :  { %v1026_v59 = vsub.f32 1.0, %v1025_v28 }
 0xc3f   :  { %1611 = vrcp.f32 %v1091_v7  ;;  %v1103_v14 = vand.u32 2147483648, %v1091_v7  ;;  %vm1097_vm5 = vweird.f32 %v1091_v7  ;;  %v1101_v17 = vand.u32 2147483647, %v1091_v7 }
 0xc40   :  { %v1027_v60 = vmul.f32 %v1608_v58, %v1026_v59 }
 0xc41   :  { %v1104_v19 = vor.u32 1.1754944e-38, %v1103_v14  ;;  %vm1102_vm7 = vcmp.eq.f32.partialorder %v1101_v17, 8.507059e+37 }
 0xc42   :  { %v1028_v61 = vadd.f32 %v1608_v58, %v1027_v60 }
 0xc44   :  { %v1032_v36 = vsel %vm1031_vm2, %v1608_v58, %v1028_v61 }
 0xc45   :  { %v1037_v1 = vsel %vm1034_vm3, %v1036_v0, %v1032_v36  ;;  %v1612_v43 = vpop.eup %1611 }
 0xc46   :  { %v1093_v8 = vmul.f32 %v1612_v43, %v1091_v7  ;;  %vm1098_vm4 = vweird.f32 %v1612_v43  ;;  %v1040_v23 = vmul.f32 %v1037_v1, %v2128_v35 }
 0xc47   :  { %vm1099_vm6 = vmor %vm1097_vm5, %vm1098_vm4 }
 0xc48   :  { %v1094_v41 = vsub.f32 1.0, %v1093_v8 }
 0xc4a   :  { %v1095_v10 = vmul.f32 %v1612_v43, %v1094_v41 }
 0xc4c   :  { %v1096_v11 = vadd.f32 %v1612_v43, %v1095_v10 }
 0xc4e   :  { %v1100_v18 = vsel %vm1099_vm6, %v1612_v43, %v1096_v11 }
 0xc4f   :  { %v1105_v21 = vsel %vm1102_vm7, %v1104_v19, %v1100_v18 }
 0xc50   :  { %v1108_v29 = vmul.f32 %v1105_v21, %v2133_v30 }
 0xc75   :  { %v1043_v3 = vpop.permute.xlu0 %1042 }
 0xc76   :  { %v1045_v45 = vmul.f32 %v1043_v3, %v1037_v1 }
 0xc78   :  { %1047 = vrot.lane.b32.xlu2 %v1045_v45, %s1840_s4 }
 0xca4   :  { %v1111_v20 = vpop.permute.xlu1 %1110 }
 0xca5   :  { %v1113_v22 = vmul.f32 %v1111_v20, %v1105_v21 }
 0xca7   :  { %1115 = vrot.lane.b32.xlu0 %v1113_v22, %s1840_s4 }
 0xcd2   :  { %v1048_v24 = vpop.permute.xlu2 %1047 }
 0xcd3   :  { %v2154_v25 = vadd.f32 %v1048_v24, %v1040_v23 }
 0xcd5   :  { %1613 = vtanh.f32 %v2154_v25 }
 0xcdb   :  { %v1614_v26 = vpop.eup %1613 }
 0xcdc   :  { %1053 = vrot.lane.b32.xlu1 %v1614_v26, %s1841_s6  ;;  %v126_v26 = vld [vmem:[#allocation8 + $0x38] sm:$0xff] }
 0xcdd   :  { %1465 = vmatmul.msk.f32.gmra.mxu0 %vm133_vm1, %v126_v26 }
 0xd19   :  { %v1116_v31 = vpop.permute.xlu0 %1115 }
 0xd1a   :  { %v2159_v33 = vadd.f32 %v1116_v31, %v1108_v29 }
 0xd1c   :  { %1615 = vtanh.f32 %v2159_v33 }
 0xd22   :  { %v1616_v34 = vpop.eup %1615 }
 0xd23   :  { %1121 = vrot.lane.b32.xlu2 %v1616_v34, %s1841_s6 }
 0xd4e   :  { %v1054_v40 = vpop.permute.xlu1 %1053 }
 0xd4f   :  { %v1056_v35 = vmul.f32 %v1054_v40, %v1037_v1 }
 0xd51   :  { %1058 = vrot.lane.b32.xlu0 %v1056_v35, %s1840_s4 }
 0xd7d   :  { %v1122_v42 = vpop.permute.xlu2 %1121 }
 0xd7e   :  { %v1124_v47 = vmul.f32 %v1122_v42, %v1105_v21 }
 0xd80   :  { %1126 = vrot.lane.b32.xlu1 %v1124_v47, %s1840_s4 }
 0xdc3   :  { %v1059_v30 = vpop.permute.xlu0 %1058 }
 0xdc4   :  { %1062 = vst.msk [vmem:[#allocation17 + $0x28] sm:$0xff] %vm114_vm0, %v1059_v30  ;;  %1498 = vmatmul.msk.f32.vlgmr.msra.gmra.mxu2 %vm114_vm0, %v1059_v30 }
 0xdf2   :  { %v1127_v51 = vpop.permute.xlu1 %1126 }
 0xdf3   :  { %1130 = vst.msk [vmem:[#allocation18 + $0x10] sm:$0xff] %vm114_vm0, %v1127_v51  ;;  %1500 = vmatmul.msk.f32.vlgmr.msra.gmra.mxu3 %vm114_vm0, %v1127_v51 }
 0xe47   :  { %v1152_v44 = vpop.f32.mrf.mxu2 }
 0xe48   :  { %v1155_v38 = vadd.f32 %v1152_v44, %v194_v52 }
 0xe4a   :  { %1617 = vtanh.f32 %v1155_v38  ;;  %v1499_v49 = vmul.f32 -1.442695, %v1155_v38 }
 0xe50   :  { %v1618_v53 = vpop.eup %1617 }
 0xe51   :  { %1178 = vrot.lane.b32.xlu2 %v1618_v53, %s1841_s6 }
 0xe76   :  { %v1220_v46 = vpop.f32.mrf.mxu3 }
 0xe77   :  { %v1223_v54 = vadd.f32 %v1220_v46, %v1993_v32 }
 0xe79   :  { %1619 = vtanh.f32 %v1223_v54  ;;  %v1501_v60 = vmul.f32 -1.442695, %v1223_v54 }
 0xe7a   :  { %1621 = vpow2.f32 %v1499_v49 }
 0xe7f   :  { %v1620_v2 = vpop.eup %1619 }
 0xe80   :  { %1246 = vrot.lane.b32.xlu0 %v1620_v2, %s1841_s6  ;;  %v1622_v4 = vpop.eup %1621 }
 0xe81   :  { %v1159_v55 = vadd.f32 1.0, %v1622_v4 }
 0xe83   :  { %1623 = vrcp.f32 %v1159_v55  ;;  %v1171_v13 = vand.u32 2147483648, %v1159_v55  ;;  %vm1165_vm9 = vweird.f32 %v1159_v55  ;;  %v1169_v15 = vand.u32 2147483647, %v1159_v55 }
 0xe84   :  { %1625 = vpow2.f32 %v1501_v60 }
 0xe85   :  { %v1172_v16 = vor.u32 1.1754944e-38, %v1171_v13  ;;  %vm1170_vm11 = vcmp.eq.f32.partialorder %v1169_v15, 8.507059e+37 }
 0xe89   :  { %v1624_v6 = vpop.eup %1623 }
 0xe8a   :  { %v1161_v9 = vmul.f32 %v1624_v6, %v1159_v55  ;;  %vm1166_vm8 = vweird.f32 %v1624_v6  ;;  %v1626_v61 = vpop.eup %1625 }
 0xe8b   :  { %vm1167_vm10 = vmor %vm1165_vm9, %vm1166_vm8  ;;  %v1227_v62 = vadd.f32 1.0, %v1626_v61 }
 0xe8c   :  { %v1162_v56 = vsub.f32 1.0, %v1161_v9 }
 0xe8d   :  { %1627 = vrcp.f32 %v1227_v62  ;;  %v1239_v45 = vand.u32 2147483648, %v1227_v62  ;;  %vm1233_vm13 = vweird.f32 %v1227_v62  ;;  %v1237_v5 = vand.u32 2147483647, %v1227_v62 }
 0xe8e   :  { %v1163_v57 = vmul.f32 %v1624_v6, %v1162_v56 }
 0xe8f   :  { %v1240_v7 = vor.u32 1.1754944e-38, %v1239_v45  ;;  %vm1238_vm15 = vcmp.eq.f32.partialorder %v1237_v5, 8.507059e+37 }
 0xe90   :  { %v1164_v12 = vadd.f32 %v1624_v6, %v1163_v57 }
 0xe92   :  { %v1168_v32 = vsel %vm1167_vm10, %v1624_v6, %v1164_v12 }
 0xe93   :  { %v1173_v28 = vsel %vm1170_vm11, %v1172_v16, %v1168_v32  ;;  %v1628_v63 = vpop.eup %1627 }
 0xe94   :  { %v1229_v36 = vmul.f32 %v1628_v63, %v1227_v62  ;;  %vm1234_vm12 = vweird.f32 %v1628_v63  ;;  %v1176_v10 = vmul.f32 %v1173_v28, %v2154_v25 }
 0xe95   :  { %vm1235_vm14 = vmor %vm1233_vm13, %vm1234_vm12 }
 0xe96   :  { %v1230_v0 = vsub.f32 1.0, %v1229_v36 }
 0xe98   :  { %v1231_v1 = vmul.f32 %v1628_v63, %v1230_v0 }
 0xe9a   :  { %v1232_v3 = vadd.f32 %v1628_v63, %v1231_v1 }
 0xe9c   :  { %v1236_v39 = vsel %vm1235_vm14, %v1628_v63, %v1232_v3 }
 0xe9d   :  { %v1241_v43 = vsel %vm1238_vm15, %v1240_v7, %v1236_v39 }
 0xe9e   :  { %v1244_v18 = vmul.f32 %v1241_v43, %v2159_v33  ;;  %v196_v33 = vpop.f32.mrf.mxu0 }
 0xe9f   :  { %v197_v34 = vadd.f32 %v2173_v37, %v196_v33 }
 0xeab   :  { %v1179_v58 = vpop.permute.xlu2 %1178 }
 0xeac   :  { %v1181_v59 = vmul.f32 %v1179_v58, %v1173_v28 }
 0xeae   :  { %1183 = vrot.lane.b32.xlu1 %v1181_v59, %s1840_s4 }
 0xef2   :  { %v1247_v8 = vpop.permute.xlu0 %1246 }
 0xef3   :  { %v1249_v41 = vmul.f32 %v1247_v8, %v1241_v43 }
 0xef5   :  { %1251 = vrot.lane.b32.xlu2 %v1249_v41, %s1840_s4 }
 0xf20   :  { %v1184_v11 = vpop.permute.xlu1 %1183 }
 0xf21   :  { %v2182_v14 = vadd.f32 %v1184_v11, %v1176_v10 }
 0xf23   :  { %1629 = vtanh.f32 %v2182_v14 }
 0xf29   :  { %v1630_v17 = vpop.eup %1629 }
 0xf2a   :  { %1189 = vrot.lane.b32.xlu0 %v1630_v17, %s1841_s6 }
 0xf4f   :  { %v1252_v19 = vpop.permute.xlu2 %1251 }
 0xf50   :  { %v2187_v20 = vadd.f32 %v1252_v19, %v1244_v18 }
 0xf52   :  { %1631 = vtanh.f32 %v2187_v20 }
 0xf58   :  { %v1632_v21 = vpop.eup %1631 }
 0xf59   :  { %1257 = vrot.lane.b32.xlu1 %v1632_v21, %s1841_s6 }
 0xf9c   :  { %v1190_v22 = vpop.permute.xlu0 %1189 }
 0xf9d   :  { %v1192_v23 = vmul.f32 %v1190_v22, %v1173_v28 }
 0xf9f   :  { %1194 = vrot.lane.b32.xlu2 %v1192_v23, %s1840_s4 }
 0xfcb   :  { %v1258_v24 = vpop.permute.xlu1 %1257 }
 0xfcc   :  { %v1260_v25 = vmul.f32 %v1258_v24, %v1241_v43 }
 0xfce   :  { %1262 = vrot.lane.b32.xlu0 %v1260_v25, %s1840_s4 }
 0xff9   :  { %v1195_v29 = vpop.permute.xlu2 %1194 }
 0xffa   :  { %1198 = vst.msk [vmem:[#allocation17 + $0x30] sm:$0xff] %vm114_vm0, %v1195_v29  ;;  %1502 = vmatmul.msk.f32.vlgmr.msrb.gmra.mxu2 %vm114_vm0, %v1195_v29 }
0x1040   :  { %v1263_v31 = vpop.permute.xlu0 %1262 }
0x1041   :  { %1266 = vst.msk [vmem:[#allocation18 + $0x8] sm:$0xff] %vm114_vm0, %v1263_v31  ;;  %1504 = vmatmul.msk.f32.vlgmr.msrb.gmra.mxu3 %vm114_vm0, %v1263_v31 }
0x107d   :  { %v1288_v40 = vpop.f32.mrf.mxu2 }
0x107e   :  { %v1291_v35 = vadd.f32 %v1288_v40, %v197_v34 }
0x1080   :  { %1633 = vtanh.f32 %v1291_v35  ;;  %v1503_v30 = vmul.f32 -1.442695, %v1291_v35 }
0x1086   :  { %v1634_v42 = vpop.eup %1633 }
0x1087   :  { %1314 = vrot.lane.b32.xlu1 %v1634_v42, %s1841_s6 }
0x10c4   :  { %v1355_v47 = vpop.f32.mrf.mxu3 }
0x10c5   :  { %v1358_v50 = vadd.f32 %v1355_v47, %v1985_v27 }
0x10c7   :  { %1635 = vtanh.f32 %v1358_v50  ;;  %v1505_v9 = vmul.f32 -1.442695, %v1358_v50 }
0x10c8   :  { %1637 = vpow2.f32 %v1503_v30 }
0x10cd   :  { %v1636_v51 = vpop.eup %1635 }
0x10ce   :  { %1381 = vrot.lane.b32.xlu2 %v1636_v51, %s1841_s6  ;;  %v1638_v48 = vpop.eup %1637 }
0x10cf   :  { %v1295_v52 = vadd.f32 1.0, %v1638_v48 }
0x10d1   :  { %1639 = vrcp.f32 %v1295_v52  ;;  %v1307_v54 = vand.u32 2147483648, %v1295_v52  ;;  %vm1301_vm2 = vweird.f32 %v1295_v52  ;;  %v1305_v49 = vand.u32 2147483647, %v1295_v52 }
0x10d2   :  { %1641 = vpow2.f32 %v1505_v9 }
0x10d3   :  { %v1308_v2 = vor.u32 1.1754944e-38, %v1307_v54  ;;  %vm1306_vm4 = vcmp.eq.f32.partialorder %v1305_v49, 8.507059e+37 }
0x10d7   :  { %v1640_v44 = vpop.eup %1639 }
0x10d8   :  { %v1297_v37 = vmul.f32 %v1640_v44, %v1295_v52  ;;  %vm1302_vm1 = vweird.f32 %v1640_v44  ;;  %v1642_v56 = vpop.eup %1641 }
0x10d9   :  { %vm1303_vm3 = vmor %vm1301_vm2, %vm1302_vm1  ;;  %v1362_v57 = vadd.f32 1.0, %v1642_v56 }
0x10da   :  { %v1298_v38 = vsub.f32 1.0, %v1297_v37 }
0x10db   :  { %1643 = vrcp.f32 %v1362_v57  ;;  %v1374_v58 = vand.u32 2147483648, %v1362_v57  ;;  %vm1368_vm6 = vweird.f32 %v1362_v57  ;;  %v1372_v28 = vand.u32 2147483647, %v1362_v57 }
0x10dc   :  { %v1299_v53 = vmul.f32 %v1640_v44, %v1298_v38 }
0x10dd   :  { %v1375_v60 = vor.u32 1.1754944e-38, %v1374_v58  ;;  %vm1373_vm8 = vcmp.eq.f32.partialorder %v1372_v28, 8.507059e+37 }
0x10de   :  { %v1300_v46 = vadd.f32 %v1640_v44, %v1299_v53 }
0x10e0   :  { %v1304_v27 = vsel %vm1303_vm3, %v1640_v44, %v1300_v46 }
0x10e1   :  { %v1309_v55 = vsel %vm1306_vm4, %v1308_v2, %v1304_v27  ;;  %v1644_v12 = vpop.eup %1643 }
0x10e2   :  { %v1364_v13 = vmul.f32 %v1644_v12, %v1362_v57  ;;  %vm1369_vm5 = vweird.f32 %v1644_v12  ;;  %v1312_v36 = vmul.f32 %v1309_v55, %v2182_v14 }
0x10e3   :  { %vm1370_vm7 = vmor %vm1368_vm6, %vm1369_vm5 }
0x10e4   :  { %v1365_v15 = vsub.f32 1.0, %v1364_v13 }
0x10e6   :  { %v1366_v32 = vmul.f32 %v1644_v12, %v1365_v15 }
0x10e8   :  { %v1367_v16 = vadd.f32 %v1644_v12, %v1366_v32 }
0x10ea   :  { %v1371_v59 = vsel %vm1370_vm7, %v1644_v12, %v1367_v16 }
0x10eb   :  { %v1376_v62 = vsel %vm1373_vm8, %v1375_v60, %v1371_v59 }
0x10ec   :  { %v1379_v45 = vmul.f32 %v1376_v62, %v2187_v20 }
0x10f9   :  { %v1315_v4 = vpop.permute.xlu1 %1314 }
0x10fa   :  { %v1317_v6 = vmul.f32 %v1315_v4, %v1309_v55 }
0x10fc   :  { %1319 = vrot.lane.b32.xlu0 %v1317_v6, %s1840_s4 }
0x1128   :  { %v1382_v61 = vpop.permute.xlu2 %1381 }
0x1129   :  { %v1384_v63 = vmul.f32 %v1382_v61, %v1376_v62 }
0x112b   :  { %1386 = vrot.lane.b32.xlu1 %v1384_v63, %s1840_s4 }
0x116e   :  { %v1320_v0 = vpop.permute.xlu0 %1319 }
0x116f   :  { %v1322_v1 = vadd.f32 %v1320_v0, %v1312_v36 }
0x1171   :  { %1645 = vtanh.f32 %v1322_v1 }
0x1177   :  { %v1646_v3 = vpop.eup %1645 }
0x1178   :  { %1325 = vrot.lane.b32.xlu2 %v1646_v3, %s1841_s6 }
0x119d   :  { %v1387_v5 = vpop.permute.xlu1 %1386 }
0x119e   :  { %v1389_v39 = vadd.f32 %v1387_v5, %v1379_v45 }
0x11a0   :  { %1647 = vtanh.f32 %v1389_v39 }
0x11a6   :  { %v1648_v7 = vpop.eup %1647 }
0x11a7   :  { %1392 = vrot.lane.b32.xlu0 %v1648_v7, %s1841_s6 }
0x11af   :  { %1403 = vrot.lane.b32.xlu0 %v1322_v1, %s1842_s5 }
0x11d2   :  { %v1326_v43 = vpop.permute.xlu2 %1325 }
0x11d3   :  { %v1328_v8 = vmul.f32 %v1326_v43, %v1309_v55 }
0x11d5   :  { %1330 = vrot.lane.b32.xlu1 %v1328_v8, %s1840_s4 }
0x11dd   :  { %1409 = vrot.lane.b32.xlu1 %v1389_v39, %s1842_s5 }
0x1219   :  { %v1393_v41 = vpop.permute.xlu0 %1392 }
0x121a   :  { %v1395_v10 = vmul.f32 %v1393_v41, %v1376_v62 }
0x121c   :  { %1397 = vrot.lane.b32.xlu2 %v1395_v10, %s1840_s4 }
0x1221   :  { %v1404_v11 = vpop.permute.xlu0 %1403 }
0x1222   :  { %1406 = vst.msk [vmem:[#allocation3] sm:$0xff] %vm114_vm0, %v1404_v11 }
0x1247   :  { %v1331_v14 = vpop.permute.xlu1 %1330 }
0x1248   :  { %1334 = vst.msk [vmem:[#allocation17 + $0x38] sm:$0xff] %vm114_vm0, %v1331_v14 }
0x1249   :  { %1401 = vst.msk [vmem:[#allocation2] sm:$0xff] %vm114_vm0, %v1331_v14  ;;  %1425 = dma.vmem_to_hbm [thread:$0]  %s1418_s15, 1024, %s1420_s18, [#allocation10], %s1833_s13, %s1833_s13, %s1834_s14  }
0x124f   :  { %v1410_v17 = vpop.permute.xlu1 %1409 }
0x1250   :  { %1412 = vst.msk [vmem:[#allocation5] sm:$0xff] %vm114_vm0, %v1410_v17 }
0x1276   :  { %v1398_v18 = vpop.permute.xlu2 %1397 }
0x1277   :  { %1400 = vst.msk [vmem:[#allocation18] sm:$0xff] %vm114_vm0, %v1398_v18 }
0x1278   :  { %1407 = vst.msk [vmem:[#allocation4] sm:$0xff] %vm114_vm0, %v1398_v18  ;;  %1442 = dma.vmem_to_hbm [thread:$0]  %s1435_s3, 1024, %s1437_s7, [#allocation19], %s1833_s13, %s1833_s13, %s1834_s14  }
0x1279   :  { %1828 = dma.done.wait [#allocation10], 1024  }
0x127a   :  { %1829 = vsyncadd [#allocation10], 4294966272 }
0x127b   :  { %1830 = dma.done.wait [#allocation19], 1024  }
0x127c   :  { %1831 = vsyncadd [#allocation19], 4294966272 }
0x127d   :  { %1451 = vsyncpa [#allocation9], 1 }
0x127e   :  { %1452 = vsyncpa [#allocation12], 1 }
0x127f   :  { %1453 = vsyncpa [#allocation15], 1 }
0x1280   :  { %1454 = vsyncpa [#allocation10], 1 }
0x1281   :  { %1455 = vsyncpa [#allocation19], 1 }

</bundles_post_ra>
